<compile_context>
chip_gen: v7x
topology: tpu7x:2x2x1
jax: 0.10.0
libtpu: 0.0.40
codegen_flags: <defaults>
</compile_context>

<pallas_src>
import functools
import math

import jax
import jax.numpy as jnp
from jax.experimental import pallas as pl
from jax.experimental.pallas import tpu as pltpu

LN_EPS = 1e-5  # PyTorch LayerNorm default


def _layernorm(y, gamma, beta):
    mean = jnp.mean(y, axis=-1, keepdims=True)
    var = jnp.mean((y - mean) ** 2, axis=-1, keepdims=True)
    return (y - mean) * jax.lax.rsqrt(var + LN_EPS) * gamma + beta


# ---------------------------------------------------------------------------
# Fused kernel: grid = (batch_chunk, layer); one grid step == one encoder
# layer on one batch chunk; activations stay in a persistent VMEM scratch.
# ---------------------------------------------------------------------------
def fused_encoder_kernel(x_ref, wqkv_ref, wo_ref, w1_ref, w2_ref, vec_ref,
                         o_ref, x_scratch,
                         *, num_heads, batch, seq, d_model, d_ff):
    layer = pl.program_id(1)

    # Load the tokens of this batch chunk once (layer 0); afterwards the
    # activations live in the persistent VMEM scratch across layer steps.
    @pl.when(layer == 0)
    def _():
        x_scratch[...] = x_ref[...].astype(jnp.float32)

    x = x_scratch[...]                           # (bs, E), f32
    bs = batch * seq
    e = d_model
    d = e // num_heads
    scale = 1.0 / math.sqrt(d)

    # Packed tiny per-layer vectors (one DMA): rows =
    # [bqkv, bo, b1, b2, g1, beta1, g2, beta2], lane-padded to max width.
    vecs = vec_ref[...]                          # (8, max_w), f32
    bqkv, bo = vecs[0:1, :3 * e], vecs[1:2, :e]
    b1, b2 = vecs[2:3, :d_ff], vecs[3:4, :e]
    g1, beta1 = vecs[4:5, :e], vecs[5:6, :e]
    g2, beta2 = vecs[6:7, :e], vecs[7:8, :e]

    # ---- fused Q/K/V projection: one (bs,E)@(E,3E) bf16 matmul ------------
    qkv = jnp.dot(x.astype(jnp.bfloat16), wqkv_ref[...],
                  preferred_element_type=jnp.float32) + bqkv      # (bs, 3E)

    # ---- per-head attention (64-lane slices of the fused qkv) -------------
    ao_heads = []
    for h in range(num_heads):                   # static unroll; H is tiny
        q = qkv[:, h * d:(h + 1) * d].reshape(batch, seq, d)
        k = qkv[:, e + h * d:e + (h + 1) * d].reshape(batch, seq, d)
        v = qkv[:, 2 * e + h * d:2 * e + (h + 1) * d].reshape(batch, seq, d)
        s = jnp.einsum('bqd,bkd->bqk', q.astype(jnp.bfloat16),
                       k.astype(jnp.bfloat16),
                       preferred_element_type=jnp.float32) * scale
        s = s - jnp.max(s, axis=-1, keepdims=True)
        p = jnp.exp(s)
        p = p / jnp.sum(p, axis=-1, keepdims=True)        # exact divide (f32)
        ao = jnp.einsum('bqk,bkd->bqd', p.astype(jnp.bfloat16),
                        v.astype(jnp.bfloat16),
                        preferred_element_type=jnp.float32)
        ao_heads.append(ao.reshape(bs, d))
    ao_full = jnp.concatenate(ao_heads, axis=-1)          # (bs, E) head concat

    # ---- out projection: one full K=E matmul -------------------------------
    attn = jnp.dot(ao_full.astype(jnp.bfloat16), wo_ref[...],
                   preferred_element_type=jnp.float32) + bo

    # ---- residual + LayerNorm 1 --------------------------------------------
    y = _layernorm(x + attn, g1, beta1)

    # ---- feed-forward: Linear -> ReLU -> Linear ----------------------------
    h1 = jnp.maximum(
        jnp.dot(y.astype(jnp.bfloat16), w1_ref[...],
                preferred_element_type=jnp.float32) + b1, 0.0)
    h2 = jnp.dot(h1.astype(jnp.bfloat16), w2_ref[...],
                 preferred_element_type=jnp.float32) + b2

    # ---- residual + LayerNorm 2 --------------------------------------------
    z = _layernorm(y + h2, g2, beta2)
    x_scratch[...] = z                           # carry to next layer (VMEM)

    @pl.when(layer == pl.num_programs(1) - 1)
    def _():
        o_ref[...] = z.astype(o_ref.dtype)       # lane-dense (E = 128) store


def _weight_spec(p):
    ndim_rest = p.ndim - 1
    # Leading layer axis squeezed; one layer's weights per layer grid step.
    return pl.BlockSpec((None,) + p.shape[1:],
                        lambda b, l, _n=ndim_rest: (l,) + (0,) * _n)


def run_fused_encoder(x2d, packed, num_heads, batch, seq, batch_chunk=1):
    bs_total, e = x2d.shape
    num_layers = packed["wqkv"].shape[0]
    d_ff = packed["w1"].shape[-1]
    assert batch % batch_chunk == 0
    n_bchunks = batch // batch_chunk
    rows = batch_chunk * seq                     # whole sequences per chunk

    weights = [packed["wqkv"], packed["wo"], packed["w1"], packed["w2"],
               packed["vecs"]]

    in_specs = [pl.BlockSpec((rows, e), lambda b, l: (b, 0))]
    in_specs += [_weight_spec(p) for p in weights]

    kernel = functools.partial(fused_encoder_kernel, num_heads=num_heads,
                               batch=batch_chunk, seq=seq, d_model=e,
                               d_ff=d_ff)
    return pl.pallas_call(
        kernel,
        out_shape=jax.ShapeDtypeStruct((bs_total, e), x2d.dtype),
        grid_spec=pltpu.PrefetchScalarGridSpec(
            num_scalar_prefetch=0,
            grid=(n_bchunks, num_layers),
            in_specs=in_specs,
            out_specs=pl.BlockSpec((rows, e), lambda b, l: (b, 0)),
            scratch_shapes=[pltpu.VMEM((rows, e), jnp.float32)],
        ),
        compiler_params=pltpu.CompilerParams(
            # batch chunks are independent (v7x: both TCs); layers sequential
            dimension_semantics=("parallel", "arbitrary"),
            vmem_limit_bytes=32 * 1024 * 1024,
        ),
    )(x2d, *weights)


def transformer_encoder_forward(x_nchw, packed_params, num_heads,
                                batch_chunk=1):
    """Matches TransformerEncoder.forward: (B,C,H,W) -> (B,C,H,W)."""
    B, C, H, W = x_nchw.shape
    S = H * W
    x = jnp.transpose(x_nchw.reshape(B, C, S), (0, 2, 1))      # (B, S, E)
    x2d = x.reshape(B * S, C)                                  # token-major
    out2d = run_fused_encoder(x2d, packed_params, num_heads, batch=B, seq=S,
                              batch_chunk=batch_chunk)
    return out2d.reshape(B, S, C).transpose(0, 2, 1).reshape(B, C, H, W)


# ---------------------------------------------------------------------------
# Parameter handling: PyTorch-layout params -> stacked / pre-transposed /
# bf16 / packed arrays for the fused kernel.
# ---------------------------------------------------------------------------
def init_torch_layout_params(key, num_layers, d_model, dim_feedforward):
    params = []
    for _ in range(num_layers):
        key, k1, k2, k3, k4, k5, k6, k7, k8 = jax.random.split(key, 9)
        params.append({
            "wqkv": 0.05 * jax.random.normal(k1, (3 * d_model, d_model), jnp.float32),
            "bqkv": 0.05 * jax.random.normal(k2, (3 * d_model,), jnp.float32),
            "wo":   0.05 * jax.random.normal(k3, (d_model, d_model), jnp.float32),
            "bo":   0.05 * jax.random.normal(k4, (d_model,), jnp.float32),
            "w1":   0.05 * jax.random.normal(k5, (dim_feedforward, d_model), jnp.float32),
            "b1":   0.05 * jax.random.normal(k6, (dim_feedforward,), jnp.float32),
            "w2":   0.05 * jax.random.normal(k7, (d_model, dim_feedforward), jnp.float32),
            "b2":   0.05 * jax.random.normal(k8, (d_model,), jnp.float32),
            "g1": jnp.ones((d_model,), jnp.float32),
            "beta1": jnp.zeros((d_model,), jnp.float32),
            "g2": jnp.ones((d_model,), jnp.float32),
            "beta2": jnp.zeros((d_model,), jnp.float32),
        })
    return params


def prepare_params(torch_params, num_heads):
    wqkv_l, wo_l, w1_l, w2_l, vecs_l = [], [], [], [], []
    for lp in torch_params:
        E = lp["wo"].shape[0]
        d_ff = lp["w1"].shape[0]
        assert E % num_heads == 0, "d_model must be divisible by num_heads"
        # Fused QKV weight: (E, 3E) = [Wq^T | Wk^T | Wv^T]; heads are
        # contiguous 64-lane column groups inside each third.
        wqkv_l.append(lp["wqkv"].T.astype(jnp.bfloat16))       # (E, 3E)
        wo_l.append(lp["wo"].T.astype(jnp.bfloat16))           # (E, E)
        w1_l.append(lp["w1"].T.astype(jnp.bfloat16))           # (E, Dff)
        w2_l.append(lp["w2"].T.astype(jnp.bfloat16))           # (Dff, E)
        max_w = max(3 * E, d_ff, E)
        max_w = ((max_w + 127) // 128) * 128                   # lane-dense pad
        pad = lambda v: jnp.pad(v, (0, max_w - v.shape[0]))
        vecs_l.append(jnp.stack([
            pad(lp["bqkv"]), pad(lp["bo"]), pad(lp["b1"]), pad(lp["b2"]),
            pad(lp["g1"]), pad(lp["beta1"]), pad(lp["g2"]), pad(lp["beta2"]),
        ]).astype(jnp.float32))                                # (8, max_w)
    return {
        "wqkv": jnp.stack(wqkv_l),
        "wo": jnp.stack(wo_l),
        "w1": jnp.stack(w1_l),
        "w2": jnp.stack(w2_l),
        "vecs": jnp.stack(vecs_l),
    }


# ---------------------------------------------------------------------------
# Pure-JAX reference (PyTorch eval semantics, f32) for correctness checking.
# ---------------------------------------------------------------------------
def reference_forward(x_nchw, torch_params, num_heads):
    B, C, H, W = x_nchw.shape
    S, E = H * W, C
    d = E // num_heads
    hp = jax.lax.Precision.HIGHEST
    x = jnp.transpose(x_nchw.reshape(B, C, S), (0, 2, 1)).astype(jnp.float32)
    for lp in torch_params:
        qkv = jnp.einsum('bse,fe->bsf', x, lp["wqkv"], precision=hp) + lp["bqkv"]
        q, k, v = qkv[..., :E], qkv[..., E:2 * E], qkv[..., 2 * E:]

        def split(t):
            return t.reshape(B, S, num_heads, d).transpose(0, 2, 1, 3)

        qh, kh, vh = split(q), split(k), split(v)
        s = jnp.einsum('bhqd,bhkd->bhqk', qh, kh, precision=hp) / math.sqrt(d)
        p = jax.nn.softmax(s, axis=-1)
        ao = jnp.einsum('bhqk,bhkd->bhqd', p, vh, precision=hp)
        ao = ao.transpose(0, 2, 1, 3).reshape(B, S, E)
        attn = jnp.einsum('bse,fe->bsf', ao, lp["wo"], precision=hp) + lp["bo"]
        y = _layernorm(x + attn, lp["g1"], lp["beta1"])
        h1 = jax.nn.relu(jnp.einsum('bse,fe->bsf', y, lp["w1"], precision=hp) + lp["b1"])
        h2 = jnp.einsum('bsf,ef->bse', h1, lp["w2"], precision=hp) + lp["b2"]
        x = _layernorm(y + h2, lp["g2"], lp["beta2"])
    return jnp.transpose(x, (0, 2, 1)).reshape(B, C, H, W)


if __name__ == "__main__":
    # Small config consistent with the module defaults:
    # d_model (== C) = latent_dim = 128, num_heads = 2, num_layers = 2, Dff = 512.
    B, C, H, W = 2, 128, 4, 4
    NUM_HEADS = 2
    NUM_LAYERS = 2
    DIM_FF = 512

    key = jax.random.PRNGKey(0)
    key, kx = jax.random.split(key)
    x = jax.random.normal(kx, (B, C, H, W), jnp.float32)

    torch_params = init_torch_layout_params(key, NUM_LAYERS, C, DIM_FF)
    packed = prepare_params(torch_params, NUM_HEADS)

    fwd = jax.jit(functools.partial(transformer_encoder_forward,
                                    num_heads=NUM_HEADS, batch_chunk=1))
    out = jax.block_until_ready(fwd(x, packed))

    assert out.shape == (B, C, H, W), out.shape
    assert bool(jnp.all(jnp.isfinite(out)))

    # Reference is full f32; the kernel uses bf16 MXU operands, so allow a
    # bf16-sized tolerance (typical err ~1e-2, genuine bugs give O(1) errors).
    ref = reference_forward(x, torch_params, NUM_HEADS)
    max_err = float(jnp.max(jnp.abs(out - ref)))
    mean_err = float(jnp.mean(jnp.abs(out - ref)))
    assert max_err < 6e-2, f"max abs error vs reference = {max_err}"
    assert mean_err < 1e-2, f"mean abs error vs reference = {mean_err}"

    print("KERNEL_OK")
</pallas_src>

<mosaic_0001>
module attributes {stable_mosaic.version = 11 : i64} {
  func.func @fused_encoder_kernel(%arg0: i32, %arg1: i32, %arg2: memref<16x128xf32, #tpu.memory_space<vmem>>, %arg3: memref<1x128x384xbf16, #tpu.memory_space<vmem>>, %arg4: memref<1x128x128xbf16, #tpu.memory_space<vmem>>, %arg5: memref<1x128x512xbf16, #tpu.memory_space<vmem>>, %arg6: memref<1x512x128xbf16, #tpu.memory_space<vmem>>, %arg7: memref<1x8x512xf32, #tpu.memory_space<vmem>>, %arg8: memref<16x128xf32, #tpu.memory_space<vmem>>, %arg9: memref<16x128xf32, #tpu.memory_space<vmem>>) attributes {dimension_semantics = [#tpu.dimension_semantics<parallel>, #tpu.dimension_semantics<arbitrary>], iteration_bounds = array<i64: 2, 2>, scalar_prefetch = 0 : i64, scratch_operands = 1 : i64, tpu.core_type = #tpu.core_type<tc>, window_params = [{transform_indices = @transform_0, window_bounds = array<i64: 16, 128>}, {transform_indices = @transform_1, window_bounds = array<i64: 1, 128, 384>}, {transform_indices = @transform_2, window_bounds = array<i64: 1, 128, 128>}, {transform_indices = @transform_3, window_bounds = array<i64: 1, 128, 512>}, {transform_indices = @transform_4, window_bounds = array<i64: 1, 512, 128>}, {transform_indices = @transform_5, window_bounds = array<i64: 1, 8, 512>}, {transform_indices = @transform_6, window_bounds = array<i64: 16, 128>}]} {
    %c0_i32 = arith.constant 0 : i32
    %0 = arith.cmpi eq, %arg1, %c0_i32 : i32
    %1 = arith.extui %0 : i1 to i32
    %c0_i32_0 = arith.constant 0 : i32
    %2 = arith.cmpi ne, %1, %c0_i32_0 : i32
    scf.if %2 {
      %c0_44 = arith.constant 0 : index
      %c0_45 = arith.constant 0 : index
      %139 = vector.load %arg2[%c0_44, %c0_45] : memref<16x128xf32, #tpu.memory_space<vmem>>, vector<16x128xf32>
      %c0_46 = arith.constant 0 : index
      %c0_47 = arith.constant 0 : index
      %140 = vector.load %arg9[%c0_46, %c0_47] : memref<16x128xf32, #tpu.memory_space<vmem>>, vector<16x128xf32>
      tpu.vector_store %arg9[%c0_46, %c0_47], %139 {strides = array<i32>} : memref<16x128xf32, #tpu.memory_space<vmem>>, vector<16x128xf32>,
    } else {
    }
    %c0 = arith.constant 0 : index
    %c0_1 = arith.constant 0 : index
    %3 = vector.load %arg9[%c0, %c0_1] : memref<16x128xf32, #tpu.memory_space<vmem>>, vector<16x128xf32>
    %c0_2 = arith.constant 0 : index
    %c0_3 = arith.constant 0 : index
    %c0_4 = arith.constant 0 : index
    %4 = vector.load %arg7[%c0_2, %c0_3, %c0_4] : memref<1x8x512xf32, #tpu.memory_space<vmem>>, vector<1x8x512xf32>
    %5 = vector.shape_cast %4 : vector<1x8x512xf32> to vector<8x512xf32>
    %6 = vector.extract_strided_slice %5 {offsets = [0, 0], sizes = [1, 384], strides = [1, 1]} : vector<8x512xf32> to vector<1x384xf32>
    %7 = vector.extract_strided_slice %5 {offsets = [1, 0], sizes = [1, 128], strides = [1, 1]} : vector<8x512xf32> to vector<1x128xf32>
    %8 = vector.extract_strided_slice %5 {offsets = [2, 0], sizes = [1, 512], strides = [1, 1]} : vector<8x512xf32> to vector<1x512xf32>
    %9 = vector.extract_strided_slice %5 {offsets = [3, 0], sizes = [1, 128], strides = [1, 1]} : vector<8x512xf32> to vector<1x128xf32>
    %10 = vector.extract_strided_slice %5 {offsets = [4, 0], sizes = [1, 128], strides = [1, 1]} : vector<8x512xf32> to vector<1x128xf32>
    %11 = vector.extract_strided_slice %5 {offsets = [5, 0], sizes = [1, 128], strides = [1, 1]} : vector<8x512xf32> to vector<1x128xf32>
    %12 = vector.extract_strided_slice %5 {offsets = [6, 0], sizes = [1, 128], strides = [1, 1]} : vector<8x512xf32> to vector<1x128xf32>
    %13 = vector.extract_strided_slice %5 {offsets = [7, 0], sizes = [1, 128], strides = [1, 1]} : vector<8x512xf32> to vector<1x128xf32>
    %14 = arith.truncf %3 : vector<16x128xf32> to vector<16x128xbf16>
    %c0_5 = arith.constant 0 : index
    %c0_6 = arith.constant 0 : index
    %c0_7 = arith.constant 0 : index
    %15 = vector.load %arg3[%c0_5, %c0_6, %c0_7] : memref<1x128x384xbf16, #tpu.memory_space<vmem>>, vector<1x128x384xbf16>
    %16 = vector.shape_cast %15 : vector<1x128x384xbf16> to vector<128x384xbf16>
    %cst = arith.constant dense<0.000000e+00> : vector<16x384xf32>
    %17 = tpu.matmul %14, %16, %cst {dimension_numbers = #tpu.dot_dimension_numbers<[1], [0], [0], [1], [0, 0, 1, 1], [], []>} : vector<16x128xbf16>, vector<128x384xbf16>, vector<16x384xf32> -> vector<16x384xf32>
    %18 = vector.broadcast %6 : vector<1x384xf32> to vector<16x384xf32>
    %19 = arith.addf %17, %18 : vector<16x384xf32>
    %20 = vector.extract_strided_slice %19 {offsets = [0, 0], sizes = [16, 64], strides = [1, 1]} : vector<16x384xf32> to vector<16x64xf32>
    %21 = vector.shape_cast %20 : vector<16x64xf32> to vector<1x16x64xf32>
    %22 = vector.extract_strided_slice %19 {offsets = [0, 128], sizes = [16, 64], strides = [1, 1]} : vector<16x384xf32> to vector<16x64xf32>
    %23 = vector.shape_cast %22 : vector<16x64xf32> to vector<1x16x64xf32>
    %24 = vector.extract_strided_slice %19 {offsets = [0, 256], sizes = [16, 64], strides = [1, 1]} : vector<16x384xf32> to vector<16x64xf32>
    %25 = vector.shape_cast %24 : vector<16x64xf32> to vector<1x16x64xf32>
    %26 = arith.truncf %21 : vector<1x16x64xf32> to vector<1x16x64xbf16>
    %27 = arith.truncf %23 : vector<1x16x64xf32> to vector<1x16x64xbf16>
    "tpu.trace_start"() <{level = 10 : i32, message = "bqd,bkd->bqk"}> : () -> ()
    %cst_8 = arith.constant dense<0.000000e+00> : vector<1x16x16xf32>
    %28 = tpu.matmul %26, %27, %cst_8 {dimension_numbers = #tpu.dot_dimension_numbers<[2], [2], [1], [1], [0, 0, 0, 1, 1, 1], [0], [0]>} : vector<1x16x64xbf16>, vector<1x16x64xbf16>, vector<1x16x16xf32> -> vector<1x16x16xf32>
    "tpu.trace_stop"() : () -> ()
    %cst_9 = arith.constant 1.250000e-01 : f32
    %29 = vector.broadcast %cst_9 : f32 to vector<1x16x16xf32>
    %30 = arith.mulf %28, %29 : vector<1x16x16xf32>
    %cst_10 = arith.constant dense<0xFF800000> : vector<1x16xf32>
    %31 = vector.multi_reduction <maximumf>, %30, %cst_10 [2] : vector<1x16x16xf32> to vector<1x16xf32>
    %32 = vector.shape_cast %31 : vector<1x16xf32> to vector<1x16x1xf32>
    %33 = vector.broadcast %32 : vector<1x16x1xf32> to vector<1x16x16xf32>
    %34 = arith.subf %30, %33 : vector<1x16x16xf32>
    %35 = math.exp %34 : vector<1x16x16xf32>
    %cst_11 = arith.constant dense<0.000000e+00> : vector<1x16xf32>
    %36 = vector.multi_reduction <add>, %35, %cst_11 [2] : vector<1x16x16xf32> to vector<1x16xf32>
    %37 = vector.shape_cast %36 : vector<1x16xf32> to vector<1x16x1xf32>
    %38 = vector.broadcast %37 : vector<1x16x1xf32> to vector<1x16x16xf32>
    %39 = arith.divf %35, %38 : vector<1x16x16xf32>
    %40 = arith.truncf %39 : vector<1x16x16xf32> to vector<1x16x16xbf16>
    %41 = arith.truncf %25 : vector<1x16x64xf32> to vector<1x16x64xbf16>
    "tpu.trace_start"() <{level = 10 : i32, message = "bqk,bkd->bqd"}> : () -> ()
    %cst_12 = arith.constant dense<0.000000e+00> : vector<1x16x64xf32>
    %42 = tpu.matmul %40, %41, %cst_12 {dimension_numbers = #tpu.dot_dimension_numbers<[2], [1], [1], [2], [0, 0, 0, 1, 1, 2], [0], [0]>} : vector<1x16x16xbf16>, vector<1x16x64xbf16>, vector<1x16x64xf32> -> vector<1x16x64xf32>
    "tpu.trace_stop"() : () -> ()
    %43 = vector.shape_cast %42 : vector<1x16x64xf32> to vector<16x64xf32>
    %44 = vector.extract_strided_slice %19 {offsets = [0, 64], sizes = [16, 64], strides = [1, 1]} : vector<16x384xf32> to vector<16x64xf32>
    %45 = vector.shape_cast %44 : vector<16x64xf32> to vector<1x16x64xf32>
    %46 = vector.extract_strided_slice %19 {offsets = [0, 192], sizes = [16, 64], strides = [1, 1]} : vector<16x384xf32> to vector<16x64xf32>
    %47 = vector.shape_cast %46 : vector<16x64xf32> to vector<1x16x64xf32>
    %48 = vector.extract_strided_slice %19 {offsets = [0, 320], sizes = [16, 64], strides = [1, 1]} : vector<16x384xf32> to vector<16x64xf32>
    %49 = vector.shape_cast %48 : vector<16x64xf32> to vector<1x16x64xf32>
    %50 = arith.truncf %45 : vector<1x16x64xf32> to vector<1x16x64xbf16>
    %51 = arith.truncf %47 : vector<1x16x64xf32> to vector<1x16x64xbf16>
    "tpu.trace_start"() <{level = 10 : i32, message = "bqd,bkd->bqk"}> : () -> ()
    %cst_13 = arith.constant dense<0.000000e+00> : vector<1x16x16xf32>
    %52 = tpu.matmul %50, %51, %cst_13 {dimension_numbers = #tpu.dot_dimension_numbers<[2], [2], [1], [1], [0, 0, 0, 1, 1, 1], [0], [0]>} : vector<1x16x64xbf16>, vector<1x16x64xbf16>, vector<1x16x16xf32> -> vector<1x16x16xf32>
    "tpu.trace_stop"() : () -> ()
    %cst_14 = arith.constant 1.250000e-01 : f32
    %53 = vector.broadcast %cst_14 : f32 to vector<1x16x16xf32>
    %54 = arith.mulf %52, %53 : vector<1x16x16xf32>
    %cst_15 = arith.constant dense<0xFF800000> : vector<1x16xf32>
    %55 = vector.multi_reduction <maximumf>, %54, %cst_15 [2] : vector<1x16x16xf32> to vector<1x16xf32>
    %56 = vector.shape_cast %55 : vector<1x16xf32> to vector<1x16x1xf32>
    %57 = vector.broadcast %56 : vector<1x16x1xf32> to vector<1x16x16xf32>
    %58 = arith.subf %54, %57 : vector<1x16x16xf32>
    %59 = math.exp %58 : vector<1x16x16xf32>
    %cst_16 = arith.constant dense<0.000000e+00> : vector<1x16xf32>
    %60 = vector.multi_reduction <add>, %59, %cst_16 [2] : vector<1x16x16xf32> to vector<1x16xf32>
    %61 = vector.shape_cast %60 : vector<1x16xf32> to vector<1x16x1xf32>
    %62 = vector.broadcast %61 : vector<1x16x1xf32> to vector<1x16x16xf32>
    %63 = arith.divf %59, %62 : vector<1x16x16xf32>
    %64 = arith.truncf %63 : vector<1x16x16xf32> to vector<1x16x16xbf16>
    %65 = arith.truncf %49 : vector<1x16x64xf32> to vector<1x16x64xbf16>
    "tpu.trace_start"() <{level = 10 : i32, message = "bqk,bkd->bqd"}> : () -> ()
    %cst_17 = arith.constant dense<0.000000e+00> : vector<1x16x64xf32>
    %66 = tpu.matmul %64, %65, %cst_17 {dimension_numbers = #tpu.dot_dimension_numbers<[2], [1], [1], [2], [0, 0, 0, 1, 1, 2], [0], [0]>} : vector<1x16x16xbf16>, vector<1x16x64xbf16>, vector<1x16x64xf32> -> vector<1x16x64xf32>
    "tpu.trace_stop"() : () -> ()
    %67 = vector.shape_cast %66 : vector<1x16x64xf32> to vector<16x64xf32>
    %68 = tpu.concatenate %43, %67 in 1 : vector<16x64xf32>, vector<16x64xf32> -> vector<16x128xf32>
    %69 = arith.truncf %68 : vector<16x128xf32> to vector<16x128xbf16>
    %c0_18 = arith.constant 0 : index
    %c0_19 = arith.constant 0 : index
    %c0_20 = arith.constant 0 : index
    %70 = vector.load %arg4[%c0_18, %c0_19, %c0_20] : memref<1x128x128xbf16, #tpu.memory_space<vmem>>, vector<1x128x128xbf16>
    %71 = vector.shape_cast %70 : vector<1x128x128xbf16> to vector<128x128xbf16>
    %cst_21 = arith.constant dense<0.000000e+00> : vector<16x128xf32>
    %72 = tpu.matmul %69, %71, %cst_21 {dimension_numbers = #tpu.dot_dimension_numbers<[1], [0], [0], [1], [0, 0, 1, 1], [], []>} : vector<16x128xbf16>, vector<128x128xbf16>, vector<16x128xf32> -> vector<16x128xf32>
    %73 = vector.broadcast %7 : vector<1x128xf32> to vector<16x128xf32>
    %74 = arith.addf %72, %73 : vector<16x128xf32>
    %75 = arith.addf %3, %74 : vector<16x128xf32>
    %cst_22 = arith.constant dense<0.000000e+00> : vector<16xf32>
    %76 = vector.multi_reduction <add>, %75, %cst_22 [1] : vector<16x128xf32> to vector<16xf32>
    %77 = vector.shape_cast %76 : vector<16xf32> to vector<16x1xf32>
    %cst_23 = arith.constant 1.280000e+02 : f32
    %78 = vector.broadcast %cst_23 : f32 to vector<16x1xf32>
    %79 = arith.divf %77, %78 : vector<16x1xf32>
    %80 = vector.broadcast %79 : vector<16x1xf32> to vector<16x128xf32>
    %81 = arith.subf %75, %80 : vector<16x128xf32>
    %82 = arith.mulf %81, %81 : vector<16x128xf32>
    %cst_24 = arith.constant dense<0.000000e+00> : vector<16xf32>
    %83 = vector.multi_reduction <add>, %82, %cst_24 [1] : vector<16x128xf32> to vector<16xf32>
    %84 = vector.shape_cast %83 : vector<16xf32> to vector<16x1xf32>
    %cst_25 = arith.constant 1.280000e+02 : f32
    %85 = vector.broadcast %cst_25 : f32 to vector<16x1xf32>
    %86 = arith.divf %84, %85 : vector<16x1xf32>
    %87 = vector.broadcast %79 : vector<16x1xf32> to vector<16x128xf32>
    %88 = arith.subf %75, %87 : vector<16x128xf32>
    %cst_26 = arith.constant 9.99999974E-6 : f32
    %89 = vector.broadcast %cst_26 : f32 to vector<16x1xf32>
    %90 = arith.addf %86, %89 : vector<16x1xf32>
    %91 = math.rsqrt %90 : vector<16x1xf32>
    %92 = vector.broadcast %91 : vector<16x1xf32> to vector<16x128xf32>
    %93 = arith.mulf %88, %92 : vector<16x128xf32>
    %94 = vector.broadcast %10 : vector<1x128xf32> to vector<16x128xf32>
    %95 = arith.mulf %93, %94 : vector<16x128xf32>
    %96 = vector.broadcast %11 : vector<1x128xf32> to vector<16x128xf32>
    %97 = arith.addf %95, %96 : vector<16x128xf32>
    %98 = arith.truncf %97 : vector<16x128xf32> to vector<16x128xbf16>
    %c0_27 = arith.constant 0 : index
    %c0_28 = arith.constant 0 : index
    %c0_29 = arith.constant 0 : index
    %99 = vector.load %arg5[%c0_27, %c0_28, %c0_29] : memref<1x128x512xbf16, #tpu.memory_space<vmem>>, vector<1x128x512xbf16>
    %100 = vector.shape_cast %99 : vector<1x128x512xbf16> to vector<128x512xbf16>
    %cst_30 = arith.constant dense<0.000000e+00> : vector<16x512xf32>
    %101 = tpu.matmul %98, %100, %cst_30 {dimension_numbers = #tpu.dot_dimension_numbers<[1], [0], [0], [1], [0, 0, 1, 1], [], []>} : vector<16x128xbf16>, vector<128x512xbf16>, vector<16x512xf32> -> vector<16x512xf32>
    %102 = vector.broadcast %8 : vector<1x512xf32> to vector<16x512xf32>
    %103 = arith.addf %101, %102 : vector<16x512xf32>
    %cst_31 = arith.constant 0.000000e+00 : f32
    %104 = vector.broadcast %cst_31 : f32 to vector<16x512xf32>
    %105 = arith.maximumf %103, %104 : vector<16x512xf32>
    %106 = arith.truncf %105 : vector<16x512xf32> to vector<16x512xbf16>
    %c0_32 = arith.constant 0 : index
    %c0_33 = arith.constant 0 : index
    %c0_34 = arith.constant 0 : index
    %107 = vector.load %arg6[%c0_32, %c0_33, %c0_34] : memref<1x512x128xbf16, #tpu.memory_space<vmem>>, vector<1x512x128xbf16>
    %108 = vector.shape_cast %107 : vector<1x512x128xbf16> to vector<512x128xbf16>
    %cst_35 = arith.constant dense<0.000000e+00> : vector<16x128xf32>
    %109 = tpu.matmul %106, %108, %cst_35 {dimension_numbers = #tpu.dot_dimension_numbers<[1], [0], [0], [1], [0, 0, 1, 1], [], []>} : vector<16x512xbf16>, vector<512x128xbf16>, vector<16x128xf32> -> vector<16x128xf32>
    %110 = vector.broadcast %9 : vector<1x128xf32> to vector<16x128xf32>
    %111 = arith.addf %109, %110 : vector<16x128xf32>
    %112 = arith.addf %97, %111 : vector<16x128xf32>
    %cst_36 = arith.constant dense<0.000000e+00> : vector<16xf32>
    %113 = vector.multi_reduction <add>, %112, %cst_36 [1] : vector<16x128xf32> to vector<16xf32>
    %114 = vector.shape_cast %113 : vector<16xf32> to vector<16x1xf32>
    %cst_37 = arith.constant 1.280000e+02 : f32
    %115 = vector.broadcast %cst_37 : f32 to vector<16x1xf32>
    %116 = arith.divf %114, %115 : vector<16x1xf32>
    %117 = vector.broadcast %116 : vector<16x1xf32> to vector<16x128xf32>
    %118 = arith.subf %112, %117 : vector<16x128xf32>
    %119 = arith.mulf %118, %118 : vector<16x128xf32>
    %cst_38 = arith.constant dense<0.000000e+00> : vector<16xf32>
    %120 = vector.multi_reduction <add>, %119, %cst_38 [1] : vector<16x128xf32> to vector<16xf32>
    %121 = vector.shape_cast %120 : vector<16xf32> to vector<16x1xf32>
    %cst_39 = arith.constant 1.280000e+02 : f32
    %122 = vector.broadcast %cst_39 : f32 to vector<16x1xf32>
    %123 = arith.divf %121, %122 : vector<16x1xf32>
    %124 = vector.broadcast %116 : vector<16x1xf32> to vector<16x128xf32>
    %125 = arith.subf %112, %124 : vector<16x128xf32>
    %cst_40 = arith.constant 9.99999974E-6 : f32
    %126 = vector.broadcast %cst_40 : f32 to vector<16x1xf32>
    %127 = arith.addf %123, %126 : vector<16x1xf32>
    %128 = math.rsqrt %127 : vector<16x1xf32>
    %129 = vector.broadcast %128 : vector<16x1xf32> to vector<16x128xf32>
    %130 = arith.mulf %125, %129 : vector<16x128xf32>
    %131 = vector.broadcast %12 : vector<1x128xf32> to vector<16x128xf32>
    %132 = arith.mulf %130, %131 : vector<16x128xf32>
    %133 = vector.broadcast %13 : vector<1x128xf32> to vector<16x128xf32>
    %134 = arith.addf %132, %133 : vector<16x128xf32>
    %c0_41 = arith.constant 0 : index
    %c0_42 = arith.constant 0 : index
    %135 = vector.load %arg9[%c0_41, %c0_42] : memref<16x128xf32, #tpu.memory_space<vmem>>, vector<16x128xf32>
    tpu.vector_store %arg9[%c0_41, %c0_42], %134 {strides = array<i32>} : memref<16x128xf32, #tpu.memory_space<vmem>>, vector<16x128xf32>,
    %c1_i32 = arith.constant 1 : i32
    %136 = arith.cmpi eq, %arg1, %c1_i32 : i32
    %137 = arith.extui %136 : i1 to i32
    %c0_i32_43 = arith.constant 0 : i32
    %138 = arith.cmpi ne, %137, %c0_i32_43 : i32
    scf.if %138 {
      %c0_44 = arith.constant 0 : index
      %c0_45 = arith.constant 0 : index
      %139 = vector.load %arg8[%c0_44, %c0_45] : memref<16x128xf32, #tpu.memory_space<vmem>>, vector<16x128xf32>
      tpu.vector_store %arg8[%c0_44, %c0_45], %134 {strides = array<i32>} : memref<16x128xf32, #tpu.memory_space<vmem>>, vector<16x128xf32>,
    } else {
    }
    return
  }
  func.func @transform_0(%arg0: i32, %arg1: i32) -> (i32, i32) {
    %c0_i32 = arith.constant 0 : i32
    %c0_i32_0 = arith.constant 0 : i32
    return %arg0, %c0_i32 : i32, i32
  }
  func.func @transform_1(%arg0: i32, %arg1: i32) -> (i32, i32, i32) {
    %c0_i32 = arith.constant 0 : i32
    %c0_i32_0 = arith.constant 0 : i32
    %c0_i32_1 = arith.constant 0 : i32
    return %arg1, %c0_i32, %c0_i32_0 : i32, i32, i32
  }
  func.func @transform_2(%arg0: i32, %arg1: i32) -> (i32, i32, i32) {
    %c0_i32 = arith.constant 0 : i32
    %c0_i32_0 = arith.constant 0 : i32
    %c0_i32_1 = arith.constant 0 : i32
    return %arg1, %c0_i32, %c0_i32_0 : i32, i32, i32
  }
  func.func @transform_3(%arg0: i32, %arg1: i32) -> (i32, i32, i32) {
    %c0_i32 = arith.constant 0 : i32
    %c0_i32_0 = arith.constant 0 : i32
    %c0_i32_1 = arith.constant 0 : i32
    return %arg1, %c0_i32, %c0_i32_0 : i32, i32, i32
  }
  func.func @transform_4(%arg0: i32, %arg1: i32) -> (i32, i32, i32) {
    %c0_i32 = arith.constant 0 : i32
    %c0_i32_0 = arith.constant 0 : i32
    %c0_i32_1 = arith.constant 0 : i32
    return %arg1, %c0_i32, %c0_i32_0 : i32, i32, i32
  }
  func.func @transform_5(%arg0: i32, %arg1: i32) -> (i32, i32, i32) {
    %c0_i32 = arith.constant 0 : i32
    %c0_i32_0 = arith.constant 0 : i32
    %c0_i32_1 = arith.constant 0 : i32
    return %arg1, %c0_i32, %c0_i32_0 : i32, i32, i32
  }
  func.func @transform_6(%arg0: i32, %arg1: i32) -> (i32, i32) {
    %c0_i32 = arith.constant 0 : i32
    %c0_i32_0 = arith.constant 0 : i32
    return %arg0, %c0_i32 : i32, i32
  }
}

</mosaic_0001>

<bundles_post_ra>
// kernel: transformer_encoder_forward.1
= control target key start
LH: loop header
LB: loop body
LE: loop exit
PB: predicated region body
PF: predicated region fallthrough
CT: control target
= control target key end

     0   :  { %s3690_s0 = inlined_call_operand.hbm [shape: f32[32,128], index: 0, kind: input, shape index: {}]   ;;  %s3691_s1 = inlined_call_operand.hbm [shape: bf16[2,128,384], index: 1, kind: input, shape index: {}]   ;;  %s3692_s2 = inlined_call_operand.hbm [shape: bf16[2,128,128], index: 2, kind: input, shape index: {}]   ;;  %s3693_s3 = inlined_call_operand.hbm [shape: bf16[2,128,512], index: 3, kind: input, shape index: {}]   ;;  %s3694_s4 = inlined_call_operand.hbm [shape: bf16[2,512,128], index: 4, kind: input, shape index: {}]   ;;  %s3695_s5 = inlined_call_operand.hbm [shape: f32[2,8,512], index: 5, kind: input, shape index: {}]   ;;  %s3696_s6 = inlined_call_operand.hbm [shape: f32[32,128], index: 6, kind: output, shape index: {}]  }
   0x1   :  { %3718 = sst [smem:[#allocation32_spill]] %s3690_s0 }
   0x2   :  { %3719 = sst [smem:[#allocation33_spill]] %s3691_s1 }
   0x3   :  { %3720 = sst [smem:[#allocation34_spill]] %s3693_s3 }
   0x4   :  { %3721 = sst [smem:[#allocation35_spill]] %s3695_s5 }
   0x5   :  { %3722 = sst [smem:[#allocation36_spill]] %s3696_s6 }
   0x6   :  { %11 = vsyncpa [#allocation4], 0 }
   0x7   :  { %13 = vsyncpa [#allocation4 + $0x1], 0 }
   0x8   :  { %14 = vsyncpa [#allocation7], 0 }
   0x9   :  { %16 = vsyncpa [#allocation7 + $0x1], 0 }
   0xa   :  { %17 = vsyncpa [#allocation10], 0 }
   0xb   :  { %19 = vsyncpa [#allocation10 + $0x1], 0 }
   0xc   :  { %20 = vsyncpa [#allocation13], 0 }
   0xd   :  { %22 = vsyncpa [#allocation13 + $0x1], 0 }
   0xe   :  { %23 = vsyncpa [#allocation5], 0 }
   0xf   :  { %25 = vsyncpa [#allocation5 + $0x1], 0  ;;  %s2991_s21 = smov 0   ;;  %s2993_s22 = smov 0  }
  0x10   :  { %s2995_s23 = smov 0   ;;  %s2997_s24 = smov 0  }
  0x11   :  { %s2999_s25 = smov 0   ;;  %s3001_s26 = smov 0  }
  0x12   :  { %s3003_s27 = smov 0   ;;  %s3005_s28 = smov 0  }
  0x13   :  { %s3007_s29 = smov 0   ;;  %s3009_s30 = smov 0  }
  0x14   :  { %s3011_s7 = smov 0  }
  0x15 LB: > { %3723 = sst [smem:[#allocation20_spill]] %s2901_s23  ;;  %p3699_p0 = scmp.eq.s32.totalorder %s2933_s7, 0  ;;  %s2933_s7 = sphi %s3011_s7, %s31_s7   ;;  %s2929_s30 = sphi %s3009_s30, %s3782_s30   ;;  %s2925_s29 = sphi %s3007_s29, %s3781_s29   ;;  %s2921_s28 = sphi %s3005_s28, %s3773_s28   ;;  %s2917_s27 = sphi %s3003_s27, %s3780_s27   ;;  %s2913_s26 = sphi %s3001_s26, %s3772_s26   ;;  %s2909_s25 = sphi %s2999_s25, %s3779_s25   ;;  %s2905_s24 = sphi %s2997_s24, %s3778_s24   ;;  %s2901_s23 = sphi %s2995_s23, %s3770_s23   ;;  %s2897_s22 = sphi %s2993_s22, %s3777_s22   ;;  %s2893_s21 = sphi %s2991_s21, %s3776_s21  }
  0x16   : > { %3724 = sst [smem:[#allocation21_spill]] %s2913_s26  ;;  %p83_p1 = scmp.ne.s32.totalorder %s2901_s23, %s2897_s22 }
  0x17   : > { %3725 = sst [smem:[#allocation22_spill]] %s2917_s27  ;;  %p3698_p3 = scmp.lt.s32.totalorder %s2933_s7, 4 }
  0x18   : > { %3726 = sst [smem:[#allocation23_spill]] %s2921_s28  ;;  %p85_p4 = por %p83_p1, %p3699_p0 }
  0x19   : > { %3727 = sst [smem:[#allocation24_spill]] %s2929_s30  ;;  %s3697_s9 = sand.u32 1, %s2933_s7  }
  0x1a   : > { %s3057_s10 = sand.u32 1, %s2901_s23   ;;  %p3062_p5 = pnand %p3698_p3, %p85_p4 }
  0x1b   : > { %s2326_s11 = smul.u32 192, %s3057_s10  ;;  %s3729_s1 = sld [smem:[#allocation33_spill]] }
  0x1c   : > { %s3728_s12 = scalar_select %p3062_p5, 1, 0 }
  0x1d   : > { %s2327_s13 = smul.u32 3072, %s2925_s29  ;;  %s268_s17 = scalar_lea.vmem [#allocation6], %s2326_s11 }
  0x1e   : > { %s275_s18 = sshll.u32 %s268_s17, 4  ;;  %s3076_s19 = scalar_lea.sflag [#allocation7], %s3697_s9  ;;  %s3072_s18 = int_to_ptr.vmem [resolvable:$true] %s275_s18 }
  0x1f   : > { %p3082_p7 = pneg %p3062_p5 }
  0x21   : > { %s3070_s16 = scalar_lea.hbm %s3729_s1, %s2327_s13  ;;  %s2624_s11 = scalar_lea.hbm %s3729_s1, 6144 }
  0x22   : > { %s2619_s20 = scalar_lea.hbm %s3070_s16, 3072  ;;  %p2625_p10 = scmp.lt.u32.totalorder %s3070_s16, %s3729_s1 }
  0x23   : > { %p2620_p6 = scmp.ne.s32.totalorder %s3070_s16, %s2619_s20  ;;  %p2626_p11 = scmp.lt.u32.totalorder %s2624_s11, %s2619_s20 }
  0x24   : > { %p2628_p13 = scmp.lt.u32.totalorder %s2619_s20, %s3070_s16 }
  0x25   : > { %p2622_p8 = pnand %p3082_p7, %p2620_p6  ;;  %p2627_p12 = por %p2626_p11, %p2625_p10 }
  0x27   : > { %p2623_p9 = pneg %p2622_p8  ;;  %p2629_p1 = por %p2628_p13, %p2627_p12 }
  0x29   : > { %p2630_p4 = pnand %p2629_p1, %p2623_p9 }
  0x2b   : > { %2633 = shalt.err (!%p2630_p4)
}
  0x2c   : > { %s2634_s9 = scalar_lea.vmem %s3072_s18, 3072  ;;  %s2935_s13 = smov [#allocation6]  }
  0x2d   : > { %p2635_p6 = scmp.ne.s32.totalorder %s3072_s18, %s2634_s9  ;;  %s2639_s14 = sshll.u32 %s2935_s13, 4  ;;  %s2640_s14 = int_to_ptr.vmem [resolvable:$false] %s2639_s14 }
  0x2e   : > { %s2641_s15 = scalar_lea.vmem %s2640_s14, 6144  ;;  %p2642_p2 = scmp.lt.s32.totalorder %s3072_s18, %s2640_s14 }
  0x2f   : > { %p2637_p8 = pnand %p2635_p6, %p3082_p7  ;;  %p2643_p0 = scmp.lt.s32.totalorder %s2641_s15, %s2634_s9 }
  0x31   : > { %p2638_p3 = pneg %p2637_p8  ;;  %p2644_p10 = por %p2643_p0, %p2642_p2 }
  0x33   : > { %p2645_p11 = pnand %p2644_p10, %p2638_p3 }
  0x35   : > { %2648 = shalt.err (!%p2645_p11)
}
  0x36   : > { %s2936_s20 = smov 192   ;;  %s2937_s11 = smov 12  }
  0x37   : > { %2349 = dma.hbm_to_vmem [thread:$0]  (!%p3062_p5), %s3070_s16, 3072, %s3072_s18, %s3076_s19, %s2936_s20, %s2936_s20, %s2937_s11  }
  0x38   : > { %p2072_p9 = scmp.ge.s32.totalorder %s2933_s7, 1  ;;  %p365_p0 = scmp.lt.s32.totalorder %s2933_s7, 5 }
  0x39   : > { %s3701_s9 = sshll.u32 %s3057_s10, 8  ;;  %s2188_s13 = sshll.u32 %s2925_s29, 12 }
  0x3a   : > { %p3109_p2 = pnand %p2072_p9, %p365_p0  ;;  %s310_s14 = scalar_lea.vmem [#allocation9], %s3701_s9 }
  0x3b   : > { %s317_s15 = sshll.u32 %s310_s14, 4  ;;  %s3733_s3 = sld [smem:[#allocation34_spill]]  ;;  %s3123_s15 = int_to_ptr.vmem [resolvable:$true] %s317_s15 }
  0x3c   : > { %s3731_s17 = scalar_select %p3109_p2, 1, 0 }
  0x3d   : > { %s3734_s16 = sand.u32 1, %s2933_s7  }
  0x3e   : > { %3732 = sst [smem:[#allocation25_spill]] %s3731_s17  ;;  %s3127_s18 = scalar_lea.sflag [#allocation10], %s3734_s16 }
  0x41   : > { %s3121_s28 = scalar_lea.hbm %s3733_s3, %s2188_s13  ;;  %s2654_s1 = scalar_lea.hbm %s3733_s3, 8192 }
  0x42   : > { %s2649_s20 = scalar_lea.hbm %s3121_s28, 4096  ;;  %p2655_p1 = scmp.lt.u32.totalorder %s3121_s28, %s3733_s3 }
  0x43   : > { %p2650_p3 = scmp.ne.s32.totalorder %s3121_s28, %s2649_s20  ;;  %p2656_p4 = scmp.lt.u32.totalorder %s2654_s1, %s2649_s20 }
  0x44   : > { %p2658_p8 = scmp.lt.u32.totalorder %s2649_s20, %s3121_s28 }
  0x45   : > { %p2652_p12 = pnand %p2650_p3, %p3082_p7  ;;  %p2657_p6 = por %p2656_p4, %p2655_p1 }
  0x47   : > { %p2653_p13 = pneg %p2652_p12  ;;  %p2659_p10 = por %p2658_p8, %p2657_p6 }
  0x49   : > { %p2660_p11 = pnand %p2659_p10, %p2653_p13 }
  0x4b   : > { %2663 = shalt.err (!%p2660_p11)
}
  0x4c   : > { %s2664_s16 = scalar_lea.vmem %s3123_s15, 4096  ;;  %s2938_s11 = smov [#allocation9]  }
  0x4d   : > { %p2665_p9 = scmp.ne.s32.totalorder %s3123_s15, %s2664_s16  ;;  %s2669_s14 = sshll.u32 %s2938_s11, 4  ;;  %s2670_s14 = int_to_ptr.vmem [resolvable:$false] %s2669_s14 }
  0x4e   : > { %s2671_s9 = scalar_lea.vmem %s2670_s14, 8192  ;;  %p2672_p12 = scmp.lt.s32.totalorder %s3123_s15, %s2670_s14 }
  0x4f   : > { %p2667_p0 = pnand %p2665_p9, %p3082_p7  ;;  %p2673_p2 = scmp.lt.s32.totalorder %s2671_s9, %s2664_s16 }
  0x51   : > { %p2668_p3 = pneg %p2667_p0  ;;  %p2674_p1 = por %p2673_p2, %p2672_p12 }
  0x53   : > { %p2675_p4 = pnand %p2674_p1, %p2668_p3 }
  0x55   : > { %2678 = shalt.err (!%p2675_p4)
}
  0x56   : > { %s2939_s20 = smov 256   ;;  %s2940_s1 = smov 16  }
  0x57   : > { %2355 = dma.hbm_to_vmem [thread:$0]  (!%p3062_p5), %s3121_s28, 4096, %s3123_s15, %s3127_s18, %s2939_s20, %s2939_s20, %s2940_s1  }
  0x58   : > { %s3156_s11 = scalar_lea.hbm %s3694_s4, %s2188_s13  ;;  %s3735_s14 = sshll.u32 %s3057_s10, 8 }
  0x59   : > { %s331_s9 = scalar_lea.vmem [#allocation11], %s3735_s14  ;;  %s3163_s27 = sadd.s32 4294967295, %s2933_s7  }
  0x5a   : > { %s338_s3 = sshll.u32 %s331_s9, 4  ;;  %s2053_s17 = sadd.s32 4294967294, %s2933_s7   ;;  %s3160_s3 = int_to_ptr.vmem [resolvable:$true] %s338_s3 }
  0x5b   : > { %s40_s28 = sadd.s32 1, %s2925_s29  ;;  %s43_s15 = sadd.s32 1, %s2929_s30 }
  0x5c   : > { %p41_p2 = scmp.ge.s32.totalorder %s40_s28, 2  ;;  %s50_s13 = sadd.s32 1, %s2913_s26 }
  0x5d   : > { %p57_p13 = scmp.ne.s32.totalorder %s2913_s26, %s2909_s25  ;;  %p63_p6 = scmp.ne.s32.totalorder %s2909_s25, %s2905_s24 }
  0x5e   : > { %s3784_s28 = smov (%p41_p2, %s40_s28), 0  ;;  %s3786_s15 = smov (!%p41_p2, %s43_s15), %s2929_s30 }
  0x5f   : > { %3736 = sst [smem:[#allocation26_spill]] %s3784_s28  ;;  %p3737_p8 = scmp.eq.s32.totalorder %s2933_s7, 0 }
  0x60   : > { %p64_p11 = scmp.eq.s32.totalorder %s3163_s27, 0  ;;  %p45_p9 = scmp.ge.s32.totalorder %s3786_s15, 2 }
  0x61   : > { %p3181_p10 = por %p3737_p8, %p57_p13  ;;  %s73_s1 = ssub.s32 %s2925_s29, %s3784_s28 }
  0x62   : > { %p3191_p0 = por %p64_p11, %p63_p6  ;;  %p74_p3 = scmp.eq.s32.totalorder %s73_s1, 0 }
  0x63   : > { %s3788_s15 = smov (%p45_p9, %s3786_s15), 0  ;;  %s3742_s16 = sadd.s32 1, %s2901_s23 }
  0x64   : > { %s3739_s6 = scalar_select %p3191_p0, 1, 0 }
  0x65   : > { %3741 = sst [smem:[#allocation28_spill]] %s3788_s15  ;;  %s47_s9 = ssub.s32 %s2929_s30, %s3788_s15 }
  0x66   : > { %3740 = sst [smem:[#allocation27_spill]] %s3739_s6  ;;  %p3744_p12 = scmp.ne.s32.totalorder %s2897_s22, %s2893_s21 }
  0x67   : > { %s3200_s14 = scalar_select %p74_p3, %s2901_s23, %s3742_s16  }
  0x68   : > { %p3207_p1 = por %p3744_p12, %p64_p11  ;;  %p48_p4 = scmp.eq.s32.totalorder %s47_s9, 0 }
  0x69   : > { %3743 = sst [smem:[#allocation29_spill]] %s3200_s14  ;;  %p217_p2 = scmp.eq.s32.totalorder %s3163_s27, 3 }
  0x6a   : > { %s3745_s5 = scalar_select %p3207_p1, 1, 0 }
  0x6b   : > { %p223_p8 = scmp.eq.s32.totalorder %s2053_s17, 3  ;;  %s243_s28 = sand.u32 1, %s2913_s26  }
  0x6c   : > { %s3214_s1 = scalar_select %p48_p4, %s2913_s26, %s50_s13  }
  0x6d   : > { %p3219_p9 = por %p217_p2, %p57_p13  ;;  %p3226_p3 = por %p223_p8, %p63_p6 }
  0x6e   : > { %3746 = sst [smem:[#allocation30_spill]] %s3214_s1  ;;  %s2056_s21 = sshll.u32 %s243_s28, 4 }
  0x6f   : > { %s3747_s6 = scalar_select %p3219_p9, 1, 0 }
  0x70   : > { %s3748_s16 = scalar_select %p3226_p3, 1, 0 }
  0x71   : > { %s2186_s15 = sshll.u32 %s2929_s30, 8  ;;  %s3750_s0 = sld [smem:[#allocation32_spill]] }
  0x72   : > { %3749 = sst [smem:[#allocation31_spill]] %s3748_s16  ;;  %s247_s17 = scalar_lea.vmem [#allocation3], %s2056_s21 }
  0x73   : > { %s254_s13 = sshll.u32 %s247_s17, 4  ;;  %p3751_p13 = scmp.lt.s32.totalorder %s2933_s7, 4  ;;  %s3236_s13 = int_to_ptr.vmem [resolvable:$true] %s254_s13 }
  0x74   : > { %s3247_s23 = scalar_lea.sflag [#allocation4], %s243_s28 }
  0x75   : > { %p3242_p6 = pnand %p3751_p13, %p3181_p10 }
  0x77   : > { %s3234_s9 = scalar_lea.hbm %s3750_s0, %s2186_s15  ;;  %p2681_p12 = pneg %p3242_p6 }
  0x78   : > { %s2679_s15 = scalar_lea.hbm %s3234_s9, 256  ;;  %s2684_s21 = scalar_lea.hbm %s3750_s0, 512 }
  0x79   : > { %p2680_p11 = scmp.ne.s32.totalorder %s3234_s9, %s2679_s15  ;;  %p2685_p10 = scmp.lt.u32.totalorder %s3234_s9, %s3750_s0 }
  0x7a   : > { %p2686_p8 = scmp.lt.u32.totalorder %s2684_s21, %s2679_s15  ;;  %p2688_p3 = scmp.lt.u32.totalorder %s2679_s15, %s3234_s9 }
  0x7b   : > { %p2682_p4 = pnand %p2681_p12, %p2680_p11 }
  0x7c   : > { %p2687_p13 = por %p2686_p8, %p2685_p10 }
  0x7d   : > { %p2683_p2 = pneg %p2682_p4 }
  0x7e   : > { %p2689_p9 = por %p2688_p3, %p2687_p13 }
  0x80   : > { %p2690_p1 = pnand %p2689_p9, %p2683_p2 }
  0x82   : > { %2693 = shalt.err (!%p2690_p1)
}
  0x83   : > { %s2694_s28 = scalar_lea.vmem %s3236_s13, 256  ;;  %s2941_s14 = smov [#allocation3]  }
  0x84   : > { %p2695_p11 = scmp.ne.s32.totalorder %s3236_s13, %s2694_s28  ;;  %s2699_s20 = sshll.u32 %s2941_s14, 4  ;;  %s2700_s20 = int_to_ptr.vmem [resolvable:$false] %s2699_s20 }
  0x85   : > { %s2701_s26 = scalar_lea.vmem %s2700_s20, 512  ;;  %p2702_p5 = scmp.lt.s32.totalorder %s3236_s13, %s2700_s20 }
  0x86   : > { %p2697_p4 = pnand %p2695_p11, %p2681_p12  ;;  %p2703_p10 = scmp.lt.s32.totalorder %s2701_s26, %s2694_s28 }
  0x88   : > { %p2698_p0 = pneg %p2697_p4  ;;  %p2704_p8 = por %p2703_p10, %p2702_p5 }
  0x8a   : > { %p2705_p3 = pnand %p2704_p8, %p2698_p0 }
  0x8c   : > { %2708 = shalt.err (!%p2705_p3)
}
  0x8d   : > { %s2942_s15 = smov 128   ;;  %s2943_s21 = smov 8  }
  0x8e   : > { %2346 = dma.hbm_to_vmem [thread:$0]  (!%p3242_p6), %s3234_s9, 256, %s3236_s13, %s3247_s23, %s2942_s15, %s2942_s15, %s2943_s21  }
  0x8f   : > { %s2187_s17 = sshll.u32 %s2925_s29, 10  ;;  %s3753_s28 = sshll.u32 %s3057_s10, 6 }
  0x90   : > { %s3279_s20 = scalar_lea.hbm %s3692_s2, %s2187_s17  ;;  %s289_s26 = scalar_lea.vmem [#allocation8], %s3753_s28 }
  0x91   : > { %s296_s0 = sshll.u32 %s289_s26, 4  ;;  %s2709_s16 = scalar_lea.hbm %s3279_s20, 1024  ;;  %s3283_s0 = int_to_ptr.vmem [resolvable:$true] %s296_s0 }
  0x92   : > { %p2710_p5 = scmp.ne.s32.totalorder %s3279_s20, %s2709_s16  ;;  %s2714_s30 = scalar_lea.hbm %s3692_s2, 2048 }
  0x93   : > { %p2715_p9 = scmp.lt.u32.totalorder %s3279_s20, %s3692_s2  ;;  %p2716_p6 = scmp.lt.u32.totalorder %s2714_s30, %s2709_s16 }
  0x94   : > { %p2712_p0 = pnand %p2710_p5, %p3082_p7  ;;  %p2718_p2 = scmp.lt.u32.totalorder %s2709_s16, %s3279_s20 }
  0x95   : > { %p2717_p12 = por %p2716_p6, %p2715_p9 }
  0x96   : > { %p2713_p1 = pneg %p2712_p0 }
  0x97   : > { %p2719_p13 = por %p2718_p2, %p2717_p12 }
  0x99   : > { %p2720_p11 = pnand %p2719_p13, %p2713_p1 }
  0x9b   : > { %2723 = shalt.err (!%p2720_p11)
}
  0x9c   : > { %s2724_s15 = scalar_lea.vmem %s3283_s0, 1024  ;;  %s2944_s21 = smov [#allocation8]  }
  0x9d   : > { %p2725_p4 = scmp.ne.s32.totalorder %s3283_s0, %s2724_s15  ;;  %s2729_s17 = sshll.u32 %s2944_s21, 4  ;;  %s2730_s17 = int_to_ptr.vmem [resolvable:$false] %s2729_s17 }
  0x9e   : > { %s2731_s14 = scalar_lea.vmem %s2730_s17, 2048  ;;  %p2732_p3 = scmp.lt.s32.totalorder %s3283_s0, %s2730_s17 }
  0x9f   : > { %p2727_p10 = pnand %p2725_p4, %p3082_p7  ;;  %p2733_p5 = scmp.lt.s32.totalorder %s2731_s14, %s2724_s15 }
  0xa1   : > { %p2728_p8 = pneg %p2727_p10  ;;  %p2734_p0 = por %p2733_p5, %p2732_p3 }
  0xa3   : > { %p2735_p9 = pnand %p2734_p0, %p2728_p8 }
  0xa5   : > { %2738 = shalt.err (!%p2735_p9)
}
  0xa6   : > { %s2945_s16 = smov 64   ;;  %s2946_s28 = smov 4  }
  0xa7   : > { %p3754_p1 = scmp.ne.s32.totalorder %s3728_s12, 0  ;;  %s2739_s26 = scalar_lea.hbm %s3156_s11, 4096 }
  0xa8   : > { %p2740_p6 = scmp.ne.s32.totalorder %s3156_s11, %s2739_s26  ;;  %s2744_s30 = scalar_lea.hbm %s3694_s4, 8192 }
  0xa9   : > { %2352 = dma.hbm_to_vmem [thread:$0]  (!%p3754_p1), %s3279_s20, 1024, %s3283_s0, %s3076_s19, %s2945_s16, %s2945_s16, %s2946_s28  }
  0xaa   : > { %p2742_p12 = pnand %p2740_p6, %p3082_p7  ;;  %p2745_p13 = scmp.lt.u32.totalorder %s3156_s11, %s3694_s4 }
  0xab   : > { %p2746_p11 = scmp.lt.u32.totalorder %s2744_s30, %s2739_s26  ;;  %p2748_p10 = scmp.lt.u32.totalorder %s2739_s26, %s3156_s11 }
  0xac   : > { %p2743_p2 = pneg %p2742_p12 }
  0xad   : > { %p2747_p4 = por %p2746_p11, %p2745_p13 }
  0xaf   : > { %p2749_p8 = por %p2748_p10, %p2747_p4 }
  0xb1   : > { %p2750_p3 = pnand %p2749_p8, %p2743_p2 }
  0xb3   : > { %2753 = shalt.err (!%p2750_p3)
}
  0xb4   : > { %s2754_s0 = scalar_lea.vmem %s3160_s3, 4096  ;;  %s2947_s19 = smov [#allocation11]  }
  0xb5   : > { %p2755_p5 = scmp.ne.s32.totalorder %s3160_s3, %s2754_s0  ;;  %s2759_s20 = sshll.u32 %s2947_s19, 4  ;;  %s2760_s20 = int_to_ptr.vmem [resolvable:$false] %s2759_s20 }
  0xb6   : > { %s2761_s15 = scalar_lea.vmem %s2760_s20, 8192  ;;  %p2762_p6 = scmp.lt.s32.totalorder %s3160_s3, %s2760_s20 }
  0xb7   : > { %p2757_p0 = pnand %p2755_p5, %p3082_p7  ;;  %p2763_p12 = scmp.lt.s32.totalorder %s2761_s15, %s2754_s0 }
  0xb9   : > { %p2758_p9 = pneg %p2757_p0  ;;  %p2764_p13 = por %p2763_p12, %p2762_p6 }
  0xbb   : > { %p2765_p11 = pnand %p2764_p13, %p2758_p9 }
  0xbd   : > { %2768 = shalt.err (!%p2765_p11)
}
  0xbe   : > { %2358 = dma.hbm_to_vmem [thread:$0]  (!%p3754_p1), %s3156_s11, 4096, %s3160_s3, %s3127_s18, %s2945_s16, %s2945_s16, %s2946_s28  }
  0xbf   : > { %s2069_s21 = sshll.u32 %s3057_s10, 5  ;;  %s2190_s17 = sshll.u32 %s2925_s29, 9 }
  0xc0   : > { %s3755_s1 = sld [smem:[#allocation35_spill]]  ;;  %s352_s30 = scalar_lea.vmem [#allocation12], %s2069_s21 }
  0xc1   : > { %s360_s13 = sshll.u32 %s352_s30, 4  ;;  %s349_s23 = scalar_lea.sflag [#allocation13], %s3057_s10  ;;  %s361_s13 = int_to_ptr.vmem [resolvable:$true] %s360_s13 }
  0xc6   : > { %s3340_s9 = scalar_lea.hbm %s3755_s1, %s2190_s17  ;;  %s2774_s11 = scalar_lea.hbm %s3755_s1, 1024 }
  0xc7   : > { %s2769_s0 = scalar_lea.hbm %s3340_s9, 512  ;;  %p2775_p8 = scmp.lt.u32.totalorder %s3340_s9, %s3755_s1 }
  0xc8   : > { %p2770_p2 = scmp.ne.s32.totalorder %s3340_s9, %s2769_s0  ;;  %p2776_p3 = scmp.lt.u32.totalorder %s2774_s11, %s2769_s0 }
  0xc9   : > { %p2778_p0 = scmp.lt.u32.totalorder %s2769_s0, %s3340_s9 }
  0xca   : > { %p2772_p4 = pnand %p2770_p2, %p3082_p7  ;;  %p2777_p5 = por %p2776_p3, %p2775_p8 }
  0xcc   : > { %p2773_p10 = pneg %p2772_p4  ;;  %p2779_p9 = por %p2778_p0, %p2777_p5 }
  0xce   : > { %p2780_p6 = pnand %p2779_p9, %p2773_p10 }
  0xd0   : > { %2783 = shalt.err (!%p2780_p6)
}
  0xd1   : > { %s2784_s10 = scalar_lea.vmem %s361_s13, 512  ;;  %s2948_s19 = smov [#allocation12]  }
  0xd2   : > { %p2785_p12 = scmp.ne.s32.totalorder %s361_s13, %s2784_s10  ;;  %s2789_s20 = sshll.u32 %s2948_s19, 4  ;;  %s2790_s20 = int_to_ptr.vmem [resolvable:$false] %s2789_s20 }
  0xd3   : > { %s2791_s15 = scalar_lea.vmem %s2790_s20, 1024  ;;  %p2792_p2 = scmp.lt.s32.totalorder %s361_s13, %s2790_s20 }
  0xd4   : > { %p2787_p13 = pnand %p2785_p12, %p3082_p7  ;;  %p2793_p4 = scmp.lt.s32.totalorder %s2791_s15, %s2784_s10 }
  0xd6   : > { %p2788_p11 = pneg %p2787_p13  ;;  %p2794_p1 = por %p2793_p4, %p2792_p2 }
  0xd8   : > { %p2795_p3 = pnand %p2794_p1, %p2788_p11 }
  0xda   : > { %2798 = shalt.err (!%p2795_p3)
}
  0xdb   : > { %p3756_p8 = scmp.ne.s32.totalorder %s3728_s12, 0  ;;  %s3757_s21 = sld [smem:[#allocation25_spill]] }
  0xdd   : > { %2361 = dma.hbm_to_vmem [thread:$0]  (!%p3756_p8), %s3340_s9, 512, %s361_s13, %s349_s23  }
  0xe1   : > { %p3758_p10 = scmp.ne.s32.totalorder %s3757_s21, 0 }
  0xe2   : > { %s3759_s8 = sld [smem:[#allocation27_spill]] (!%p3758_p10)  ;;  %s3363_s17 = sand.u32 (!%p3758_p10), 1, %s2909_s25  }
  0xe3   : > { %369 = sbr.rel (%p3758_p10) target bundleno = 3249 (0xcb1), region = 44  ;;  %s2073_s14 = sshll.u32 (!%p3758_p10), %s3363_s17, 4 }
  0xe4   : > { %s372_s26 = scalar_lea.sflag (!%p3758_p10), [#allocation4], %s3363_s17  ;;  %s375_s30 = scalar_lea.vmem (!%p3758_p10), [#allocation3], %s2073_s14 }
  0xe8   : > { %p3760_p7 = scmp.ne.s32.totalorder (!%p3758_p10), %s3759_s8, 0 }
  0xea   : > { %2872 = dma.done.wait (%p3760_p7), %s372_s26, 256  }
  0xeb   : > { %2874 = vsyncadd (%p3760_p7), %s372_s26, 4294967040  ;;  %s380_s12 = sand.u32 1, %s3163_s27   ;;  %s382_s9 = sand.u32 1, %s2897_s22  }
  0xec   : > { %s2328_s13 = smul.u32 192, %s382_s9  ;;  %s381_s23 = scalar_lea.sflag [#allocation7], %s380_s12 }
  0xed   : > { %p3761_p1 = scmp.ne.s32.totalorder %s3745_s5, 0 }
  0xee   : > { %s3373_s0 = scalar_lea.vmem [#allocation6], %s2328_s13 }
  0xef   : > { %2876 = dma.done.wait (%p3761_p1), %s381_s23, 4096  }
  0xf0   : > { %2878 = vsyncadd (%p3761_p1), %s381_s23, 4294963200  ;;  %s2074_s3 = sshll.u32 %s382_s9, 6  ;;  %s2075_s18 = sshll.u32 %s382_s9, 8 }
  0xf1   : > { %s3379_s11 = scalar_lea.vmem [#allocation8], %s2074_s3  ;;  %s399_s16 = scalar_lea.sflag [#allocation10], %s380_s12 }
  0xf2   : > { %s3381_s28 = scalar_lea.vmem [#allocation9], %s2075_s18 }
  0xf3   : > { %2880 = dma.done.wait (%p3761_p1), %s399_s16, 8192  }
  0xf4   : > { %2882 = vsyncadd (%p3761_p1), %s399_s16, 4294959104  ;;  %s2077_s27 = sshll.u32 %s382_s9, 5  ;;  %s3387_s10 = scalar_lea.vmem [#allocation11], %s2075_s18 }
  0xf5   : > { %s417_s19 = scalar_lea.sflag [#allocation13], %s382_s9  ;;  %s3389_s20 = scalar_lea.vmem [#allocation12], %s2077_s27 }
  0xf6   : > { %2884 = dma.done.wait (%p3761_p1), %s417_s19, 512  }
  0xf7   : > { %2886 = vsyncadd (%p3761_p1), %s417_s19, 4294966784  ;;  %s3395_s15 = scalar_lea.vmem [#allocation14], %s2073_s14  ;;  %s3762_s21 = sld [smem:[#allocation22_spill]] }
  0xfd   : > { %p2079_p5 = scmp.ne.s32.totalorder %s3762_s21, 0 }
  0xfe   : > { %v481_v0 = vld [vmem:[%s375_s30] sm:$0xff] (!%p2079_p5)  ;;  %v482_v1 = vld [vmem:[%s375_s30 + $0x8] sm:$0xff] (!%p2079_p5) }
  0xff   : > { %480 = sbr.rel (%p2079_p5) target bundleno = 262 (0x106), region = 72  ;;  %483 = vst [vmem:[#allocation2] sm:$0xff] (!%p2079_p5), %v481_v0  ;;  %484 = vst [vmem:[#allocation2 + $0x8] sm:$0xff] (!%p2079_p5), %v482_v1 }
 0x106 PF: > { %v2475_v2 = vld [vmem:[%s3373_s0 + $0x4] ss:$12 sps:$4 sm:$0xff]   ;;  %v2477_v3 = vld [vmem:[%s3373_s0] ss:$12 sps:$4 sm:$0xff]   ;;  %v2949_v4 = vmov 0   ;;  %v2950_v5 = vmov 0.0   ;;  %v524_v31 = vlaneseq }
 0x107   : > { %696 = vmatprep.mubr.bf16.mxu0 %v2949_v4  ;;  %2262 = vmatprep.subr.bf16.mxu1 %v2950_v5  ;;  %v2478_v6 = vld [vmem:[%s3373_s0 + $0x1c] ss:$12 sps:$4 sm:$0xff]   ;;  %v2480_v7 = vld [vmem:[%s3373_s0 + $0x18] ss:$12 sps:$4 sm:$0xff]   ;;  %v2481_v8 = vld [vmem:[%s3373_s0 + $0x34] ss:$12 sps:$4 sm:$0xff]  }
 0x108   : > { %664 = vmatprep.subr.bf16.mxu0 %v2475_v2  ;;  %v2483_v9 = vld [vmem:[%s3373_s0 + $0x30] ss:$12 sps:$4 sm:$0xff]   ;;  %v2484_v10 = vld [vmem:[%s3373_s0 + $0x4c] ss:$12 sps:$4 sm:$0xff]   ;;  %v2486_v11 = vld [vmem:[%s3373_s0 + $0x48] ss:$12 sps:$4 sm:$0xff]  }
 0x109   : > { %665 = vmatpush1.bf16.msra.mxu0 %v2477_v3  ;;  %v2487_v12 = vld [vmem:[%s3373_s0 + $0x64] ss:$12 sps:$4 sm:$0xff]   ;;  %v2499_v13 = vld [vmem:[%s3373_s0 + $0x8] ss:$12 sps:$4 sm:$0xff]   ;;  %v2500_v14 = vld [vmem:[%s3373_s0 + $0x20] ss:$12 sps:$4 sm:$0xff]  }
 0x10a   : > { %666 = vmatprep.subr.bf16.mxu0 %v2478_v6  ;;  %2263 = vmatpush3.bf16.msra.mxu1 %v2499_v13  ;;  %v2489_v15 = vld [vmem:[%s3373_s0 + $0x60] ss:$12 sps:$4 sm:$0xff]   ;;  %v2490_v16 = vld [vmem:[%s3373_s0 + $0x7c] ss:$12 sps:$4 sm:$0xff]   ;;  %v2492_v17 = vld [vmem:[%s3373_s0 + $0x78] ss:$12 sps:$4 sm:$0xff]  }
 0x10b   : > { %2264 = vmatprep.subr.bf16.mxu1 %v2950_v5  ;;  %v2493_v18 = vld [vmem:[%s3373_s0 + $0x94] ss:$12 sps:$4 sm:$0xff]   ;;  %v2501_v19 = vld [vmem:[%s3373_s0 + $0x38] ss:$12 sps:$4 sm:$0xff]   ;;  %v2502_v20 = vld [vmem:[%s3373_s0 + $0x50] ss:$12 sps:$4 sm:$0xff]  }
 0x10c   : > { %v2495_v21 = vld [vmem:[%s3373_s0 + $0x90] ss:$12 sps:$4 sm:$0xff]   ;;  %v2496_v22 = vld [vmem:[%s3373_s0 + $0xac] ss:$12 sps:$4 sm:$0xff]   ;;  %v2503_v23 = vld [vmem:[%s3373_s0 + $0x68] ss:$12 sps:$4 sm:$0xff]  }
 0x10d   : > { %667 = vmatpush1.bf16.msra.mxu0 %v2480_v7  ;;  %v2498_v24 = vld [vmem:[%s3373_s0 + $0xa8] ss:$12 sps:$4 sm:$0xff]   ;;  %v3426_v26 = vld [vmem:[#allocation2 + $0x8] sm:$0xff]  ;;  %v2504_v27 = vld [vmem:[%s3373_s0 + $0x80] ss:$12 sps:$4 sm:$0xff]   ;;  %vm2951_vm0 = vmmov 0  }
 0x10e   : > { %668 = vmatprep.subr.bf16.mxu0 %v2481_v8  ;;  %2265 = vmatpush3.bf16.msra.mxu1 %v2500_v14  ;;  %v3424_v25 = vld [vmem:[#allocation2] sm:$0xff]  ;;  %v2505_v29 = vld [vmem:[%s3373_s0 + $0x98] ss:$12 sps:$4 sm:$0xff]   ;;  %v3445_v32 = vshrl.u32 %v524_v31, 7  ;;  %v3452_v35 = vld [vmem:[%s3389_s20 + $0x8] sm:$0xff]  ;;  %vm750_vm1 = vcmask 523264  }
 0x10f   : > { %2266 = vmatprep.subr.bf16.mxu1 %v2950_v5  ;;  %v491_v28 = vpack.c.bf16 %v3426_v26, %v3424_v25  ;;  %v2506_v30 = vld [vmem:[%s3373_s0 + $0xb0] ss:$12 sps:$4 sm:$0xff]   ;;  %2278 = vmatprep.mubr.msk.bf16.mxu1 %vm2951_vm0, %v2950_v5  ;;  %v3449_v34 = vld [vmem:[%s3389_s20] sm:$0xff]  ;;  %vm800_vm2 = vcmask 130048   ;;  %s2952_s5 = smov 64   ;;  %s3763_s8 = sld [smem:[#allocation22_spill]] }
 0x110   : > { %v526_v33 = vsub.s32 0, %v3445_v32  ;;  %v3462_v49 = vld [vmem:[%s3389_s20 + $0x10] sm:$0xff] }
 0x111   : > { %669 = vmatpush1.bf16.msra.mxu0 %v2483_v9 }
 0x112   : > { %670 = vmatprep.subr.bf16.mxu0 %v2484_v10  ;;  %2267 = vmatpush3.bf16.msra.mxu1 %v2501_v19  ;;  %v527_v36 = vrot.slane %v3449_v34, %v526_v33  ;;  %v531_v38 = vrot.slane %v3452_v35, %v526_v33  ;;  %v535_v50 = vrot.slane %v3462_v49, %v526_v33 }
 0x113   : > { %2268 = vmatprep.subr.bf16.mxu1 %v2950_v5 }
 0x115   : > { %671 = vmatpush1.bf16.msra.mxu0 %v2486_v11  ;;  %p2180_p0 = scmp.ne.s32.totalorder %s3763_s8, 1 }
 0x116   : > { %672 = vmatprep.subr.bf16.mxu0 %v2487_v12  ;;  %2269 = vmatpush3.bf16.msra.mxu1 %v2502_v20 }
 0x117   : > { %2270 = vmatprep.subr.bf16.mxu1 %v2950_v5 }
 0x119   : > { %673 = vmatpush1.bf16.msra.mxu0 %v2489_v15 }
 0x11a   : > { %674 = vmatprep.subr.bf16.mxu0 %v2490_v16  ;;  %2271 = vmatpush3.bf16.msra.mxu1 %v2503_v23 }
 0x11b   : > { %2272 = vmatprep.subr.bf16.mxu1 %v2950_v5 }
 0x11d   : > { %675 = vmatpush1.bf16.msra.mxu0 %v2492_v17 }
 0x11e   : > { %676 = vmatprep.subr.bf16.mxu0 %v2493_v18  ;;  %2273 = vmatpush3.bf16.msra.mxu1 %v2504_v27 }
 0x11f   : > { %2274 = vmatprep.subr.bf16.mxu1 %v2950_v5 }
 0x121   : > { %677 = vmatpush1.bf16.msra.mxu0 %v2495_v21 }
 0x122   : > { %678 = vmatprep.subr.bf16.mxu0 %v2496_v22  ;;  %2275 = vmatpush3.bf16.msra.mxu1 %v2505_v29 }
 0x123   : > { %2276 = vmatprep.subr.bf16.mxu1 %v2950_v5 }
 0x125   : > { %679 = vmatpush1.bf16.msra.mxu0 %v2498_v24 }
 0x126   : > { %2306 = vmatprep.subr.bf16.mxu0 %v2950_v5  ;;  %2277 = vmatpush3.bf16.msra.mxu1 %v2506_v30 }
 0x127   : > { %2282 = vmatprep.subr.bf16.mxu1 %v2950_v5 }
 0x128   : > { %697 = vmatmul.mubr.bf16.vlgmr.msra.gmra.mrb[0].mxu0 %v491_v28 }
 0x129   : > { %2322 = vmatprep.mubr.msk.bf16.mxu0 %vm2951_vm0, %v2950_v5  ;;  %2279 = vmatmul.mubr.bf16.vlgmr.msra.gmra.mrb[0].mxu1 %v491_v28 }
 0x12a   : > { %2284 = vmatprep.mubr.msk.bf16.mxu1 %vm2951_vm0, %v2950_v5 }
 0x1fb   : > { %v698_v37 = vpop.f32.mrb[0].mxu0 }
 0x1fc   : > { %v700_v39 = vpop.f32.mrb[1].mxu0  ;;  %v699_v41 = vadd.f32 %v698_v37, %v527_v36  ;;  %v741_v51 = vpop.f32.mrb[0].mxu1 }
 0x1fd   : > { %v702_v40 = vpop.f32.mrb[2].mxu0  ;;  %v701_v44 = vadd.f32 %v700_v39, %v531_v38  ;;  %v742_v52 = vadd.f32 %v741_v51, %v535_v50  ;;  %v2280_v53 = vpop.f32.mrb[1].mxu1 }
 0x1fe   : > { %v703_v42 = vadd.f32 %v702_v40, %v527_v36  ;;  %v704_v43 = vpop.f32.mrb[3].mxu0  ;;  %v744_v54 = vpop.f32.mrb[2].mxu1 }
 0x1ff   : > { %v705_v45 = vadd.f32 %v704_v43, %v531_v38  ;;  %v745_v55 = vadd.f32 %v744_v54, %v535_v50  ;;  %v2281_v56 = vpop.f32.mrb[3].mxu1 }
 0x200   : > { %v748_v46 = vpack.c.bf16 %v703_v42, %v699_v41 }
 0x201   : > { %v749_v47 = vpack.c.bf16 %v705_v45, %v701_v44  ;;  %v3465_v57 = vpack.c.bf16 %v745_v55, %v742_v52 }
 0x203   : > { %v755_v48 = vsel %vm750_vm1, %v749_v47, 0 }
 0x204   : > { %2283 = vmatpush3.bf16.xpose.msra.mxu1 %v755_v48 }
 0x205   : > { %2288 = vmatprep.subr.bf16.mxu1 %v2950_v5 }
 0x20b   : > { %2285 = vmatmul.mubr.msk.bf16.vlgmr.msra.gmra.mrb[4].mxu1 %vm750_vm1, %v748_v46 }
 0x20c   : > { %2290 = vmatprep.mubr.msk.bf16.mxu1 %vm2951_vm0, %v2950_v5  ;;  %2289 = vmatpush3.bf16.msra.mxu1 %v3465_v57 }
 0x20d   : > { %2294 = vmatprep.subr.bf16.mxu1 %v2950_v5 }
 0x2de   : > { %v791_v58 = vpop.f32.mrb[4].mxu1 }
 0x2df   : > { %v798_v59 = vmul.f32 0.125, %v791_v58  ;;  %v2286_v60 = vpop.f32.mrb[5].mxu1 }
 0x2e0   : > { %v794_v61 = vpop.f32.mrb[6].mxu1 }
 0x2e1   : > { %v799_v62 = vmul.f32 0.125, %v794_v61  ;;  %v2287_v63 = vpop.f32.mrb[7].mxu1  ;;  %v801_v0 = vsel %vm800_vm2, %v798_v59, -inf  ;;  %v2508_v61 = vld [vmem:[%s3379_s11 + $0x8] sm:$0xff]  }
 0x2e2   : > { %802 = vmax.xlane.f32.xlu0 %v801_v0  ;;  %v2510_v63 = vld [vmem:[%s3379_s11 + $0x18] sm:$0xff]   ;;  %v2511_v0 = vld [vmem:[%s3379_s11 + $0x20] sm:$0xff]  }
 0x2e3   : > { %v804_v1 = vsel %vm800_vm2, %v799_v62, -inf }
 0x2e6   : > { %805 = vmax.xlane.f32.xlu0 %v804_v1  ;;  %v2512_v1 = vld [vmem:[%s3379_s11 + $0x28] sm:$0xff]  }
 0x2fc   : > { %873 = vrot.lane.b32.xlu0 %v749_v47, %s2952_s5 }
 0x36f   : > { %v803_v2 = vpop.xlane.xlu0 %802 }
 0x370   : > { %v807_v3 = vsub.f32 %v798_v59, %v803_v2  ;;  %v2513_v2 = vld [vmem:[%s3379_s11 + $0x30] sm:$0xff]  }
 0x372   : > { %v809_v6 = vmul.f32 1.442695, %v807_v3  ;;  %v2514_v3 = vld [vmem:[%s3379_s11 + $0x38] sm:$0xff]  }
 0x373   : > { %v806_v7 = vpop.xlane.xlu0 %805 }
 0x374   : > { %2595 = vpow2.f32 %v809_v6  ;;  %v808_v8 = vsub.f32 %v799_v62, %v806_v7  ;;  %v2509_v62 = vld [vmem:[%s3379_s11 + $0x10] sm:$0xff]  }
 0x376   : > { %v811_v9 = vmul.f32 1.442695, %v808_v8 }
 0x377   : > { %v874_v20 = vpop.permute.xlu0 %873 }
 0x378   : > { %2597 = vpow2.f32 %v811_v9  ;;  %v879_v22 = vsel %vm750_vm1, %v874_v20, 0 }
 0x37e   : > { %v2596_v10 = vpop.eup %2595 }
 0x37f   : > { %v813_v11 = vsel %vm800_vm2, %v2596_v10, 0.0 }
 0x380   : > { %814 = vadd.xlane.f32.xlu1 %v813_v11 }
 0x382   : > { %v2598_v12 = vpop.eup %2597 }
 0x383   : > { %v816_v13 = vsel %vm800_vm2, %v2598_v12, 0.0 }
 0x384   : > { %817 = vadd.xlane.f32.xlu1 %v816_v13 }
 0x395   : > { %870 = vrot.lane.b32.xlu1 %v748_v46, %s2952_s5 }
 0x40d   : > { %v815_v14 = vpop.xlane.xlu1 %814 }
 0x40e   : > { %2599 = vrcp.f32 %v815_v14 }
 0x411   : > { %v818_v15 = vpop.xlane.xlu1 %817 }
 0x412   : > { %2601 = vrcp.f32 %v818_v15 }
 0x415   : > { %v871_v23 = vpop.permute.xlu1 %870 }
 0x418   : > { %v2600_v16 = vpop.eup %2599 }
 0x419   : > { %v820_v18 = vmul.f32 %v2600_v16, %v2596_v10  ;;  %v1024_v16 = vsub.s32 1, %v3445_v32 }
 0x41c   : > { %v2602_v17 = vpop.eup %2601 }
 0x41d   : > { %v822_v19 = vmul.f32 %v2602_v17, %v2598_v12  ;;  %v1025_v17 = vrot.slane %v3449_v34, %v1024_v16  ;;  %v1148_v16 = vsub.s32 5, %v3445_v32 }
 0x41f   : > { %v823_v21 = vpack.c.bf16 %v822_v19, %v820_v18 }
 0x421   : > { %2291 = vmatmul.mubr.msk.bf16.vlgmr.msra.gmra.mrb[8].mxu1 %vm800_vm2, %v823_v21 }
 0x422   : > { %2295 = vmatpush3.bf16.xpose.msra.mxu1 %v879_v22  ;;  %2296 = vmatprep.mubr.msk.bf16.mxu1 %vm2951_vm0, %v2950_v5 }
 0x423   : > { %2300 = vmatprep.subr.bf16.mxu1 %v2950_v5 }
 0x429   : > { %2297 = vmatmul.mubr.msk.bf16.vlgmr.msra.gmra.mrb[12].mxu1 %vm750_vm1, %v871_v23 }
 0x42a   : > { %2302 = vmatprep.mubr.msk.bf16.mxu1 %vm2951_vm0, %v2950_v5 }
 0x4f4   : > { %v3483_v24 = vpop.f32.mrb[8].mxu1 }
 0x4f5   : > { %v2292_v27 = vpop.f32.mrb[9].mxu1 }
 0x4f6   : > { %v3485_v28 = vpop.f32.mrb[10].mxu1  ;;  %v2515_v27 = vld [vmem:[%s3381_s28] ss:$16 sps:$4 sm:$0xff]  }
 0x4f7   : > { %v2293_v29 = vpop.f32.mrb[11].mxu1 }
 0x4f8   : > { %v2518_v29 = vld [vmem:[%s3381_s28 + $0x8] ss:$16 sps:$4 sm:$0xff]  }
 0x4fc   : > { %v915_v30 = vpop.f32.mrb[12].mxu1 }
 0x4fd   : > { %v922_v31 = vmul.f32 0.125, %v915_v30  ;;  %v2298_v33 = vpop.f32.mrb[13].mxu1  ;;  %v2520_v30 = vld [vmem:[%s3381_s28 + $0xc] ss:$16 sps:$4 sm:$0xff]  }
 0x4fe   : > { %v918_v36 = vpop.f32.mrb[14].mxu1  ;;  %v2526_v33 = vld [vmem:[%s3381_s28 + $0x2c] ss:$16 sps:$4 sm:$0xff]  }
 0x4ff   : > { %v923_v37 = vmul.f32 0.125, %v918_v36  ;;  %v2299_v38 = vpop.f32.mrb[15].mxu1  ;;  %v924_v39 = vsel %vm800_vm2, %v922_v31, -inf  ;;  %v2521_v36 = vld [vmem:[%s3381_s28 + $0x20] ss:$16 sps:$4 sm:$0xff]  }
 0x500   : > { %925 = vmax.xlane.f32.xlu1 %v924_v39 }
 0x501   : > { %v927_v40 = vsel %vm800_vm2, %v923_v37, -inf }
 0x502   : > { %928 = vmax.xlane.f32.xlu0 %v927_v40 }
 0x58d   : > { %v926_v41 = vpop.xlane.xlu1 %925 }
 0x58e   : > { %v930_v42 = vsub.f32 %v922_v31, %v926_v41  ;;  %v2523_v31 = vld [vmem:[%s3381_s28 + $0x24] ss:$16 sps:$4 sm:$0xff]  }
 0x58f   : > { %v929_v43 = vpop.xlane.xlu0 %928 }
 0x590   : > { %v932_v44 = vmul.f32 1.442695, %v930_v42  ;;  %v931_v45 = vsub.f32 %v923_v37, %v929_v43 }
 0x592   : > { %2603 = vpow2.f32 %v932_v44  ;;  %v934_v46 = vmul.f32 1.442695, %v931_v45  ;;  %v2529_v44 = vld [vmem:[%s3381_s28 + $0x44] ss:$16 sps:$4 sm:$0xff]   ;;  %v2532_v45 = vld [vmem:[%s3381_s28 + $0x4c] ss:$16 sps:$4 sm:$0xff]  }
 0x594   : > { %2605 = vpow2.f32 %v934_v46  ;;  %v2527_v46 = vld [vmem:[%s3381_s28 + $0x40] ss:$16 sps:$4 sm:$0xff]  }
 0x59c   : > { %v2604_v47 = vpop.eup %2603 }
 0x59d   : > { %v936_v48 = vsel %vm800_vm2, %v2604_v47, 0.0 }
 0x59e   : > { %v2606_v50 = vpop.eup %2605  ;;  %937 = vadd.xlane.f32.xlu0 %v936_v48  ;;  %v2535_v48 = vld [vmem:[%s3381_s28 + $0x64] ss:$16 sps:$4 sm:$0xff]  }
 0x59f   : > { %v939_v51 = vsel %vm800_vm2, %v2606_v50, 0.0 }
 0x5a0   : > { %940 = vadd.xlane.f32.xlu1 %v939_v51  ;;  %v2533_v51 = vld [vmem:[%s3381_s28 + $0x60] ss:$16 sps:$4 sm:$0xff]  }
 0x5b4   : > { %948 = vrot.lane.b32.xlu0 %v3465_v57, %s2952_s5  ;;  %v2507_v57 = vld [vmem:[%s3379_s11] sm:$0xff]  }
 0x5b5   : > { %2307 = vmatpush3.bf16.msra.mxu0 %v2507_v57  ;;  %v2548_v57 = vld [vmem:[%s3381_s28 + $0xa8] ss:$16 sps:$4 sm:$0xff]  }
 0x5b6   : > { %2308 = vmatprep.subr.bf16.mxu0 %v2950_v5 }
 0x5b9   : > { %2309 = vmatpush3.bf16.msra.mxu0 %v2508_v61  ;;  %v2553_v61 = vld [vmem:[%s3381_s28 + $0xc4] ss:$16 sps:$4 sm:$0xff]  }
 0x5ba   : > { %2310 = vmatprep.subr.bf16.mxu0 %v2950_v5 }
 0x5bd   : > { %2311 = vmatpush3.bf16.msra.mxu0 %v2509_v62  ;;  %v2556_v62 = vld [vmem:[%s3381_s28 + $0xcc] ss:$16 sps:$4 sm:$0xff]  }
 0x5be   : > { %2312 = vmatprep.subr.bf16.mxu0 %v2950_v5 }
 0x5c1   : > { %2313 = vmatpush3.bf16.msra.mxu0 %v2510_v63  ;;  %v2551_v63 = vld [vmem:[%s3381_s28 + $0xc0] ss:$16 sps:$4 sm:$0xff]  }
 0x5c2   : > { %2314 = vmatprep.subr.bf16.mxu0 %v2950_v5 }
 0x5c5   : > { %2315 = vmatpush3.bf16.msra.mxu0 %v2511_v0  ;;  %v2554_v0 = vld [vmem:[%s3381_s28 + $0xc8] ss:$16 sps:$4 sm:$0xff]  }
 0x5c6   : > { %2316 = vmatprep.subr.bf16.mxu0 %v2950_v5 }
 0x5c9   : > { %2317 = vmatpush3.bf16.msra.mxu0 %v2512_v1  ;;  %v2559_v1 = vld [vmem:[%s3381_s28 + $0xe4] ss:$16 sps:$4 sm:$0xff]  }
 0x5ca   : > { %2318 = vmatprep.subr.bf16.mxu0 %v2950_v5 }
 0x5cd   : > { %2319 = vmatpush3.bf16.msra.mxu0 %v2513_v2  ;;  %v2562_v2 = vld [vmem:[%s3381_s28 + $0xec] ss:$16 sps:$4 sm:$0xff]  }
 0x5ce   : > { %2320 = vmatprep.subr.bf16.mxu0 %v2950_v5 }
 0x5d1   : > { %2321 = vmatpush3.bf16.msra.mxu0 %v2514_v3  ;;  %v2557_v3 = vld [vmem:[%s3381_s28 + $0xe0] ss:$16 sps:$4 sm:$0xff]  }
 0x5d2   : > { %1404 = vmatprep.subr.bf16.mxu0 %v2520_v30  ;;  %v2567_v30 = vld [vmem:[%s3387_s10 + $0x48] sm:$0xff]  }
 0x62b   : > { %v938_v52 = vpop.xlane.xlu0 %937 }
 0x62c   : > { %2607 = vrcp.f32 %v938_v52  ;;  %v2536_v52 = vld [vmem:[%s3381_s28 + $0x68] ss:$16 sps:$4 sm:$0xff]  }
 0x62d   : > { %v941_v53 = vpop.xlane.xlu1 %940 }
 0x62e   : > { %2609 = vrcp.f32 %v941_v53  ;;  %v2541_v53 = vld [vmem:[%s3381_s28 + $0x84] ss:$16 sps:$4 sm:$0xff]  }
 0x62f   : > { %v949_v54 = vpop.permute.xlu0 %948 }
 0x630   : > { %2301 = vmatpush3.bf16.msra.mxu1 %v949_v54  ;;  %v2544_v54 = vld [vmem:[%s3381_s28 + $0x8c] ss:$16 sps:$4 sm:$0xff]  }
 0x636   : > { %v2608_v55 = vpop.eup %2607 }
 0x637   : > { %v943_v58 = vmul.f32 %v2608_v55, %v2604_v47  ;;  %v2530_v47 = vld [vmem:[%s3381_s28 + $0x48] ss:$16 sps:$4 sm:$0xff]   ;;  %v2539_v55 = vld [vmem:[%s3381_s28 + $0x80] ss:$16 sps:$4 sm:$0xff]  }
 0x638   : > { %v2610_v56 = vpop.eup %2609 }
 0x639   : > { %v945_v59 = vmul.f32 %v2610_v56, %v2606_v50  ;;  %v2538_v50 = vld [vmem:[%s3381_s28 + $0x6c] ss:$16 sps:$4 sm:$0xff]   ;;  %v2542_v56 = vld [vmem:[%s3381_s28 + $0x88] ss:$16 sps:$4 sm:$0xff]  }
 0x63b   : > { %v946_v60 = vpack.c.bf16 %v945_v59, %v943_v58  ;;  %v2547_v58 = vld [vmem:[%s3381_s28 + $0xa4] ss:$16 sps:$4 sm:$0xff]   ;;  %v2550_v59 = vld [vmem:[%s3381_s28 + $0xac] ss:$16 sps:$4 sm:$0xff]  }
 0x63d   : > { %2303 = vmatmul.mubr.msk.bf16.vlgmr.msra.gmra.mrb[16].mxu1 %vm800_vm2, %v946_v60  ;;  %v2545_v60 = vld [vmem:[%s3381_s28 + $0xa0] ss:$16 sps:$4 sm:$0xff]  }
 0x63e   : > { %1393 = vmatprep.mubr.bf16.mxu1 %v2949_v4 }
 0x710   : > { %v988_v6 = vpop.f32.mrb[16].mxu1 }
 0x711   : > { %v2304_v7 = vpop.f32.mrb[17].mxu1 }
 0x712   : > { %v991_v8 = vpop.f32.mrb[18].mxu1  ;;  %v2563_v7 = vld [vmem:[%s3387_s10 + $0x40] sm:$0xff]  }
 0x713   : > { %v2470_v9 = vpack.i.bf16 %v991_v8, %v988_v6  ;;  %v2305_v10 = vpop.f32.mrb[19].mxu1  ;;  %v2560_v6 = vld [vmem:[%s3381_s28 + $0xe8] ss:$16 sps:$4 sm:$0xff]   ;;  %v2564_v8 = vld [vmem:[%s3387_s10 + $0xc0] sm:$0xff]  }
 0x715   : > { %2471 = vrot.lane.b32.xlu1 %v2470_v9, %s2952_s5 }
 0x787   : > { %v2472_v11 = vpop.permute.xlu1 %2471 }
 0x788   : > { %v2474_v12 = vunpack.i.h.bf16 %v2472_v11  ;;  %v2473_v13 = vunpack.i.l.bf16 %v2472_v11 }
 0x78a   : > { %v1004_v14 = vsel %vm750_vm1, %v3485_v28, %v2474_v12  ;;  %v1003_v15 = vsel %vm750_vm1, %v3483_v24, %v2473_v13  ;;  %v2517_v28 = vld [vmem:[%s3381_s28 + $0x4] ss:$16 sps:$4 sm:$0xff]  }
 0x78b   : > { %v1005_v5 = vpack.c.bf16 %v1004_v14, %v1003_v15  ;;  %1361 = vmatprep.subr.bf16.mxu1 %v2517_v28  ;;  %v1142_v15 = vsub.s32 4, %v3445_v32  ;;  %v2566_v28 = vld [vmem:[%s3387_s10 + $0x80] sm:$0xff]  }
 0x78c   : > { %1362 = vmatpush1.bf16.msra.mxu1 %v2515_v27  ;;  %v2565_v27 = vld [vmem:[%s3387_s10] sm:$0xff]  }
 0x78d   : > { %2323 = vmatmul.mubr.bf16.vlgmr.msra.gmra.mrb[4].mxu0 %v1005_v5  ;;  %1363 = vmatprep.subr.bf16.mxu1 %v2523_v31  ;;  %v1143_v5 = vrot.slane %v3449_v34, %v1142_v15  ;;  %v2568_v31 = vld [vmem:[%s3387_s10 + $0xc8] sm:$0xff]  }
 0x78e   : > { %1436 = vmatprep.mubr.bf16.mxu0 %v2949_v4  ;;  %1405 = vmatpush1.bf16.msra.mxu0 %v2518_v29 }
 0x78f   : > { %1406 = vmatprep.subr.bf16.mxu0 %v2526_v33  ;;  %v2569_v33 = vld [vmem:[%s3387_s10 + $0x8] sm:$0xff]  }
 0x790   : > { %1364 = vmatpush1.bf16.msra.mxu1 %v2521_v36  ;;  %v2570_v36 = vld [vmem:[%s3387_s10 + $0x88] sm:$0xff]  }
 0x791   : > { %1365 = vmatprep.subr.bf16.mxu1 %v2529_v44  ;;  %v2580_v44 = vld [vmem:[%s3387_s10 + $0xe0] sm:$0xff]  }
 0x794   : > { %1366 = vmatpush1.bf16.msra.mxu1 %v2527_v46  ;;  %v2582_v46 = vld [vmem:[%s3387_s10 + $0xa0] sm:$0xff]  }
 0x795   : > { %1367 = vmatprep.subr.bf16.mxu1 %v2535_v48  ;;  %v2584_v48 = vld [vmem:[%s3387_s10 + $0xe8] sm:$0xff]  }
 0x798   : > { %1368 = vmatpush1.bf16.msra.mxu1 %v2533_v51  ;;  %v2586_v51 = vld [vmem:[%s3387_s10 + $0xa8] sm:$0xff]  }
 0x799   : > { %1369 = vmatprep.subr.bf16.mxu1 %v2541_v53  ;;  %v2588_v53 = vld [vmem:[%s3387_s10 + $0xf0] sm:$0xff]  }
 0x79c   : > { %1370 = vmatpush1.bf16.msra.mxu1 %v2539_v55  ;;  %v2590_v55 = vld [vmem:[%s3387_s10 + $0xb0] sm:$0xff]  }
 0x79d   : > { %1371 = vmatprep.subr.bf16.mxu1 %v2547_v58  ;;  %v2592_v58 = vld [vmem:[%s3387_s10 + $0xf8] sm:$0xff]  }
 0x7a0   : > { %1372 = vmatpush1.bf16.msra.mxu1 %v2545_v60  ;;  %v2594_v60 = vld [vmem:[%s3387_s10 + $0xb8] sm:$0xff]  }
 0x7a1   : > { %1373 = vmatprep.subr.bf16.mxu1 %v2553_v61  ;;  %v490_v61 = vld [vmem:[%s3389_s20 + $0x18] sm:$0xff] }
 0x7a4   : > { %1374 = vmatpush1.bf16.msra.mxu1 %v2551_v63 }
 0x7a5   : > { %1375 = vmatprep.subr.bf16.mxu1 %v2559_v1 }
 0x7a8   : > { %1376 = vmatpush1.bf16.msra.mxu1 %v2557_v3 }
 0x7a9   : > { %2218 = vmatprep.subr.bf16.mxu1 %v2563_v7 }
 0x860   : > { %v1108_v18 = vpop.f32.mrb[4].mxu0 }
 0x861   : > { %v1109_v19 = vadd.f32 %v1108_v18, %v1025_v17  ;;  %v2324_v20 = vpop.f32.mrb[5].mxu0 }
 0x862   : > { %v1111_v21 = vpop.f32.mrb[6].mxu0 }
 0x863   : > { %v1112_v22 = vadd.f32 %v1111_v21, %v1025_v17  ;;  %v2325_v23 = vpop.f32.mrb[7].mxu0  ;;  %v1115_v24 = vadd.f32 %v1109_v19, %v3424_v25  ;;  %v2524_v25 = vld [vmem:[%s3381_s28 + $0x28] ss:$16 sps:$4 sm:$0xff]  }
 0x864   : > { %1407 = vmatpush1.bf16.msra.mxu0 %v2524_v25  ;;  %v2571_v25 = vld [vmem:[%s3387_s10 + $0x50] sm:$0xff]  }
 0x865   : > { %1117 = vadd.xlane.f32.xlu1 %v1115_v24  ;;  %v1116_v4 = vadd.f32 %v1112_v22, %v3426_v26  ;;  %1408 = vmatprep.subr.bf16.mxu0 %v2532_v45  ;;  %v1149_v22 = vrot.slane %v3449_v34, %v1148_v16  ;;  %v2581_v45 = vld [vmem:[%s3387_s10 + $0x20] sm:$0xff]  }
 0x867   : > { %1119 = vadd.xlane.f32.xlu0 %v1116_v4 }
 0x868   : > { %1409 = vmatpush1.bf16.msra.mxu0 %v2530_v47  ;;  %v2583_v47 = vld [vmem:[%s3387_s10 + $0x68] sm:$0xff]  }
 0x869   : > { %1410 = vmatprep.subr.bf16.mxu0 %v2538_v50  ;;  %v2585_v50 = vld [vmem:[%s3387_s10 + $0x28] sm:$0xff]  }
 0x86c   : > { %1411 = vmatpush1.bf16.msra.mxu0 %v2536_v52  ;;  %v2587_v52 = vld [vmem:[%s3387_s10 + $0x70] sm:$0xff]  }
 0x86d   : > { %1412 = vmatprep.subr.bf16.mxu0 %v2544_v54  ;;  %v2589_v54 = vld [vmem:[%s3387_s10 + $0x30] sm:$0xff]  }
 0x870   : > { %1413 = vmatpush1.bf16.msra.mxu0 %v2542_v56  ;;  %v2591_v56 = vld [vmem:[%s3387_s10 + $0x78] sm:$0xff]  }
 0x871   : > { %1414 = vmatprep.subr.bf16.mxu0 %v2550_v59  ;;  %v2593_v59 = vld [vmem:[%s3387_s10 + $0x38] sm:$0xff]  }
 0x874   : > { %1415 = vmatpush1.bf16.msra.mxu0 %v2548_v57  ;;  %v1187_v57 = vsub.s32 2, %v3445_v32 }
 0x875   : > { %1416 = vmatprep.subr.bf16.mxu0 %v2556_v62 }
 0x876   : > { %v1188_v62 = vrot.slane %v3449_v34, %v1187_v57  ;;  %v1196_v63 = vrot.slane %v3462_v49, %v1187_v57  ;;  %v1200_v1 = vrot.slane %v490_v61, %v1187_v57 }
 0x878   : > { %1417 = vmatpush1.bf16.msra.mxu0 %v2554_v0  ;;  %v1192_v0 = vrot.slane %v3452_v35, %v1187_v57 }
 0x879   : > { %1418 = vmatprep.subr.bf16.mxu0 %v2562_v2 }
 0x87c   : > { %1419 = vmatpush1.bf16.msra.mxu0 %v2560_v6 }
 0x87d   : > { %2240 = vmatprep.subr.bf16.mxu0 %v2564_v8 }
 0x8f2   : > { %v1118_v26 = vpop.xlane.xlu1 %1117 }
 0x8f3   : > { %v1122_v37 = vmul.f32 0.0078125, %v1118_v26  ;;  %v2572_v26 = vld [vmem:[%s3387_s10 + $0xd0] sm:$0xff]  }
 0x8f4   : > { %v1120_v38 = vpop.xlane.xlu0 %1119 }
 0x8f5   : > { %v3528_v39 = vsub.f32 %v1115_v24, %v1122_v37  ;;  %v1123_v40 = vmul.f32 0.0078125, %v1120_v38  ;;  %v2573_v37 = vld [vmem:[%s3387_s10 + $0x10] sm:$0xff]  }
 0x8f6   : > { %v2574_v38 = vld [vmem:[%s3387_s10 + $0x90] sm:$0xff]  }
 0x8f7   : > { %v3530_v41 = vsub.f32 %v1116_v4, %v1123_v40  ;;  %v1126_v42 = vmul.f32 %v3528_v39, %v3528_v39  ;;  %v2576_v40 = vld [vmem:[%s3387_s10 + $0xd8] sm:$0xff]  }
 0x8f9   : > { %1128 = vadd.xlane.f32.xlu0 %v1126_v42  ;;  %v1127_v43 = vmul.f32 %v3530_v41, %v3530_v41  ;;  %v2578_v42 = vld [vmem:[%s3387_s10 + $0x98] sm:$0xff]  }
 0x8fb   : > { %1130 = vadd.xlane.f32.xlu1 %v1127_v43  ;;  %v2579_v43 = vld [vmem:[%s3387_s10 + $0x60] sm:$0xff]  }
 0x986   : > { %v1129_v9 = vpop.xlane.xlu0 %1128 }
 0x987   : > { %v1132_v10 = vmul.f32 0.0078125, %v1129_v9 }
 0x988   : > { %v1131_v11 = vpop.xlane.xlu1 %1130 }
 0x989   : > { %v1134_v12 = vadd.f32 1e-05, %v1132_v10  ;;  %v1133_v13 = vmul.f32 0.0078125, %v1131_v11 }
 0x98b   : > { %2611 = vrsqrt.f32 %v1134_v12  ;;  %v1135_v14 = vadd.f32 1e-05, %v1133_v13 }
 0x98d   : > { %2613 = vrsqrt.f32 %v1135_v14 }
 0x995   : > { %v2612_v17 = vpop.eup %2611 }
 0x996   : > { %v1138_v18 = vmul.f32 %v2612_v17, %v3528_v39  ;;  %v2575_v39 = vld [vmem:[%s3387_s10 + $0x58] sm:$0xff]  }
 0x997   : > { %v2614_v19 = vpop.eup %2613 }
 0x998   : > { %v1139_v20 = vmul.f32 %v2614_v19, %v3530_v41  ;;  %v1144_v21 = vmul.f32 %v1143_v5, %v1138_v18  ;;  %v2577_v41 = vld [vmem:[%s3387_s10 + $0x18] sm:$0xff]  }
 0x99a   : > { %v1145_v23 = vmul.f32 %v1143_v5, %v1139_v20  ;;  %v3568_v24 = vadd.f32 %v1149_v22, %v1144_v21 }
 0x99c   : > { %v3570_v4 = vadd.f32 %v1149_v22, %v1145_v23 }
 0x99e   : > { %v1152_v29 = vpack.c.bf16 %v3570_v4, %v3568_v24 }
 0x9a0   : > { %1394 = vmatmul.mubr.bf16.vlgmr.msra.gmra.mrb[20].mxu1 %v1152_v29  ;;  %1437 = vmatmul.mubr.bf16.vlgmr.msra.gmra.mrb[8].mxu0 %v1152_v29 }
 0x9a1   : > { %2219 = vmatpush3.bf16.msra.mxu1 %v2565_v27  ;;  %2241 = vmatpush3.bf16.msra.mxu0 %v2566_v28 }
 0x9a2   : > { %2220 = vmatprep.subr.bf16.mxu1 %v2567_v30  ;;  %2242 = vmatprep.subr.bf16.mxu0 %v2568_v31 }
 0x9a5   : > { %2221 = vmatpush3.bf16.msra.mxu1 %v2569_v33  ;;  %2243 = vmatpush3.bf16.msra.mxu0 %v2570_v36  ;;  %v1525_v33 = vsub.s32 3, %v3445_v32 }
 0x9a6   : > { %2222 = vmatprep.subr.bf16.mxu1 %v2571_v25  ;;  %2244 = vmatprep.subr.bf16.mxu0 %v2572_v26 }
 0x9a7   : > { %v1526_v26 = vrot.slane %v3449_v34, %v1525_v33 }
 0x9a9   : > { %2223 = vmatpush3.bf16.msra.mxu1 %v2573_v37  ;;  %2245 = vmatpush3.bf16.msra.mxu0 %v2574_v38 }
 0x9aa   : > { %2224 = vmatprep.subr.bf16.mxu1 %v2575_v39  ;;  %2246 = vmatprep.subr.bf16.mxu0 %v2576_v40 }
 0x9ad   : > { %2225 = vmatpush3.bf16.msra.mxu1 %v2577_v41  ;;  %2247 = vmatpush3.bf16.msra.mxu0 %v2578_v42 }
 0x9ae   : > { %2226 = vmatprep.subr.bf16.mxu1 %v2579_v43  ;;  %2248 = vmatprep.subr.bf16.mxu0 %v2580_v44 }
 0x9b1   : > { %2227 = vmatpush3.bf16.msra.mxu1 %v2581_v45  ;;  %2249 = vmatpush3.bf16.msra.mxu0 %v2582_v46 }
 0x9b2   : > { %2228 = vmatprep.subr.bf16.mxu1 %v2583_v47  ;;  %2250 = vmatprep.subr.bf16.mxu0 %v2584_v48 }
 0x9b5   : > { %2229 = vmatpush3.bf16.msra.mxu1 %v2585_v50  ;;  %2251 = vmatpush3.bf16.msra.mxu0 %v2586_v51 }
 0x9b6   : > { %2230 = vmatprep.subr.bf16.mxu1 %v2587_v52  ;;  %2252 = vmatprep.subr.bf16.mxu0 %v2588_v53 }
 0x9b9   : > { %2231 = vmatpush3.bf16.msra.mxu1 %v2589_v54  ;;  %2253 = vmatpush3.bf16.msra.mxu0 %v2590_v55 }
 0x9ba   : > { %2232 = vmatprep.subr.bf16.mxu1 %v2591_v56  ;;  %2254 = vmatprep.subr.bf16.mxu0 %v2592_v58 }
 0x9bd   : > { %2233 = vmatpush3.bf16.msra.mxu1 %v2593_v59  ;;  %2255 = vmatpush3.bf16.msra.mxu0 %v2594_v60 }
 0xa73   : > { %v1395_v2 = vpop.f32.mrb[20].mxu1  ;;  %v1438_v3 = vpop.f32.mrb[8].mxu0 }
 0xa74   : > { %v1396_v6 = vadd.f32 %v1395_v2, %v1188_v62  ;;  %v1439_v7 = vadd.f32 %v1438_v3, %v1196_v63  ;;  %v1397_v8 = vpop.f32.mrb[21].mxu1  ;;  %v1440_v9 = vpop.f32.mrb[9].mxu0  ;;  %v1833_v3 = vsub.s32 7, %v3445_v32 }
 0xa75   : > { %v1398_v10 = vadd.f32 %v1397_v8, %v1192_v0  ;;  %v1441_v11 = vadd.f32 %v1440_v9, %v1200_v1  ;;  %v1399_v12 = vpop.f32.mrb[22].mxu1  ;;  %v1442_v13 = vpop.f32.mrb[10].mxu0 }
 0xa76   : > { %v1400_v14 = vadd.f32 %v1399_v12, %v1188_v62  ;;  %v1443_v15 = vadd.f32 %v1442_v13, %v1196_v63  ;;  %v1401_v5 = vpop.f32.mrb[23].mxu1  ;;  %v1444_v16 = vpop.f32.mrb[11].mxu0  ;;  %v1447_v49 = vmax.f32 %v1396_v6, 0.0  ;;  %v1449_v19 = vmax.f32 %v1439_v7, 0.0 }
 0xa77   : > { %v1402_v17 = vadd.f32 %v1401_v5, %v1192_v0  ;;  %v1445_v18 = vadd.f32 %v1444_v16, %v1200_v1  ;;  %v1448_v21 = vmax.f32 %v1398_v10, 0.0  ;;  %v1450_v22 = vmax.f32 %v1441_v11, 0.0 }
 0xa78   : > { %v1451_v35 = vmax.f32 %v1400_v14, 0.0  ;;  %v1453_v20 = vmax.f32 %v1443_v15, 0.0  ;;  %v1834_v8 = vrot.slane %v3449_v34, %v1833_v3 }
 0xa79   : > { %v1452_v23 = vmax.f32 %v1402_v17, 0.0  ;;  %v1454_v27 = vmax.f32 %v1445_v18, 0.0 }
 0xa7a   : > { %v1455_v28 = vpack.c.bf16 %v1451_v35, %v1447_v49  ;;  %v1457_v29 = vpack.c.bf16 %v1453_v20, %v1449_v19 }
 0xa7b   : > { %v1456_v30 = vpack.c.bf16 %v1452_v23, %v1448_v21  ;;  %v1458_v31 = vpack.c.bf16 %v1454_v27, %v1450_v22 }
 0xa7d   : > { %1751 = vmatprep.mubr.bf16.mxu1 %v1456_v30  ;;  %1792 = vmatprep.mubr.bf16.mxu0 %v1458_v31 }
 0xa7e   : > { %1752 = vmatmul.mubr.bf16.vlgmr.msra.gmra.mrb[24].mxu1 %v1455_v28  ;;  %1793 = vmatmul.mubr.bf16.vlgmr.msra.gmra.mrb[12].mxu0 %v1457_v29 }
 0xb51   : > { %v2234_v36 = vpop.f32.mrb[24].mxu1  ;;  %v2256_v25 = vpop.f32.mrb[12].mxu0 }
 0xb52   : > { %v2235_v37 = vpop.f32.mrb[25].mxu1  ;;  %v2257_v38 = vpop.f32.mrb[13].mxu0 }
 0xb53   : > { %v2236_v39 = vadd.f32 %v2235_v37, %v2234_v36  ;;  %v2258_v40 = vadd.f32 %v2257_v38, %v2256_v25  ;;  %v2237_v41 = vpop.f32.mrb[26].mxu1  ;;  %v2259_v42 = vpop.f32.mrb[14].mxu0 }
 0xb54   : > { %v2238_v43 = vpop.f32.mrb[27].mxu1  ;;  %v2260_v44 = vpop.f32.mrb[15].mxu0 }
 0xb55   : > { %v1754_v45 = vadd.f32 %v2236_v39, %v1526_v26  ;;  %v2239_v46 = vadd.f32 %v2238_v43, %v2237_v41  ;;  %v2261_v47 = vadd.f32 %v2260_v44, %v2259_v42 }
 0xb57   : > { %v1795_v48 = vadd.f32 %v2258_v40, %v1754_v45  ;;  %v1757_v50 = vadd.f32 %v2239_v46, %v1526_v26 }
 0xb59   : > { %v1798_v51 = vadd.f32 %v2261_v47, %v1757_v50  ;;  %v1801_v52 = vadd.f32 %v1795_v48, %v3568_v24 }
 0xb5b   : > { %1803 = vadd.xlane.f32.xlu0 %v1801_v52  ;;  %v1802_v53 = vadd.f32 %v1798_v51, %v3570_v4  ;;  %v1827_v4 = vsub.s32 6, %v3445_v32 }
 0xb5d   : > { %1805 = vadd.xlane.f32.xlu1 %v1802_v53  ;;  %v1828_v6 = vrot.slane %v3449_v34, %v1827_v4 }
 0xbe8   : > { %v1804_v54 = vpop.xlane.xlu0 %1803 }
 0xbe9   : > { %v1807_v55 = vmul.f32 0.0078125, %v1804_v54 }
 0xbea   : > { %v1806_v56 = vpop.xlane.xlu1 %1805 }
 0xbeb   : > { %v1809_v58 = vsub.f32 %v1801_v52, %v1807_v55  ;;  %v1808_v59 = vmul.f32 0.0078125, %v1806_v56 }
 0xbed   : > { %v1810_v60 = vsub.f32 %v1802_v53, %v1808_v59  ;;  %v1811_v57 = vmul.f32 %v1809_v58, %v1809_v58 }
 0xbef   : > { %1813 = vadd.xlane.f32.xlu0 %v1811_v57  ;;  %v1812_v61 = vmul.f32 %v1810_v60, %v1810_v60 }
 0xbf1   : > { %1815 = vadd.xlane.f32.xlu1 %v1812_v61 }
 0xc7c   : > { %v1814_v62 = vpop.xlane.xlu0 %1813 }
 0xc7d   : > { %v1817_v63 = vmul.f32 0.0078125, %v1814_v62 }
 0xc7e   : > { %v1816_v0 = vpop.xlane.xlu1 %1815 }
 0xc7f   : > { %v1819_v1 = vadd.f32 1e-05, %v1817_v63  ;;  %v1818_v2 = vmul.f32 0.0078125, %v1816_v0 }
 0xc81   : > { %2615 = vrsqrt.f32 %v1819_v1  ;;  %v1820_v24 = vadd.f32 1e-05, %v1818_v2 }
 0xc83   : > { %2617 = vrsqrt.f32 %v1820_v24 }
 0xc8b   : > { %v2616_v7 = vpop.eup %2615 }
 0xc8c   : > { %v1823_v9 = vmul.f32 %v2616_v7, %v1809_v58 }
 0xc8d   : > { %v2618_v10 = vpop.eup %2617 }
 0xc8e   : > { %v1829_v11 = vmul.f32 %v1828_v6, %v1823_v9  ;;  %v1824_v12 = vmul.f32 %v2618_v10, %v1810_v60  ;;  %1842 = sbr.rel (%p2180_p0) target bundleno = 3221 (0xc95), region = 76 }
 0xc90   : > { %v1835_v13 = vadd.f32 %v1834_v8, %v1829_v11  ;;  %v1830_v14 = vmul.f32 %v1828_v6, %v1824_v12 }
 0xc92   : > { %1837 = vst [vmem:[#allocation2] sm:$0xff] %v1835_v13  ;;  %v1836_v15 = vadd.f32 %v1834_v8, %v1830_v14  ;;  %1843 = vst [vmem:[%s3395_s15] sm:$0xff] (!%p2180_p0), %v1835_v13 }
 0xc94   : > { %1838 = vst [vmem:[#allocation2 + $0x8] sm:$0xff] %v1836_v15  ;;  %1844 = vst [vmem:[%s3395_s15 + $0x8] sm:$0xff] (!%p2180_p0), %v1836_v15 }
 0xc95 PF: > { %s3764_s14 = sld [smem:[#allocation23_spill]]  ;;  %s3765_s9 = sld [smem:[#allocation36_spill]] }
 0xc96   : > { %s1859_s23 = sshll.u32 %s3395_s15, 4  ;;  %s1846_s0 = scalar_lea.sflag [#allocation5], %s3363_s17  ;;  %s3627_s23 = int_to_ptr.vmem [resolvable:$true] %s1859_s23 }
 0xc97   : > { %s2799_s3 = scalar_lea.vmem %s3627_s23, 256  ;;  %p3766_p6 = scmp.ne.s32.totalorder %s3747_s6, 0 }
 0xc98   : > { %p2800_p9 = scmp.ne.s32.totalorder %s3627_s23, %s2799_s3  ;;  %s2953_s18 = smov [#allocation14]  }
 0xc99   : > { %s2803_s11 = sshll.u32 %s2953_s18, 4  ;;  %s2804_s11 = int_to_ptr.vmem [resolvable:$false] %s2803_s11 }
 0xc9a   : > { %p2801_p12 = pnand %p2800_p9, %p3766_p6  ;;  %s2805_s16 = scalar_lea.vmem %s2804_s11, 512 }
 0xc9b   : > { %s2191_s26 = sshll.u32 %s3764_s14, 8  ;;  %p2806_p11 = scmp.lt.s32.totalorder %s3627_s23, %s2804_s11 }
 0xc9c   : > { %s3624_s13 = scalar_lea.hbm %s3765_s9, %s2191_s26  ;;  %p2802_p13 = pneg %p2801_p12 }
 0xc9d   : > { %p2807_p2 = scmp.lt.s32.totalorder %s2805_s16, %s2799_s3 }
 0xc9f   : > { %p2808_p4 = por %p2807_p2, %p2806_p11 }
 0xca1   : > { %p2809_p3 = pnand %p2808_p4, %p2802_p13 }
 0xca3   : > { %2812 = shalt.err (!%p2809_p3)
}
 0xca4   : > { %s2813_s28 = scalar_lea.hbm %s3624_s13, 256  ;;  %s2817_s19 = scalar_lea.hbm %s3765_s9, 512 }
 0xca5   : > { %p2814_p8 = scmp.ne.s32.totalorder %s3624_s13, %s2813_s28  ;;  %p2818_p1 = scmp.lt.u32.totalorder %s3624_s13, %s3765_s9 }
 0xca6   : > { %p2819_p5 = scmp.lt.u32.totalorder %s2817_s19, %s2813_s28  ;;  %p2821_p9 = scmp.lt.u32.totalorder %s2813_s28, %s3624_s13 }
 0xca7   : > { %p2815_p10 = pnand %p2814_p8, %p3766_p6 }
 0xca8   : > { %p2820_p0 = por %p2819_p5, %p2818_p1 }
 0xca9   : > { %p2816_p7 = pneg %p2815_p10 }
 0xcaa   : > { %p2822_p12 = por %p2821_p9, %p2820_p0 }
 0xcac   : > { %p2823_p13 = pnand %p2822_p12, %p2816_p7 }
 0xcae   : > { %2826 = shalt.err (!%p2823_p13)
}
 0xcaf   : > { %s2954_s21 = smov 128   ;;  %s2955_s5 = smov 8  }
 0xcb0   : > { %2341 = dma.vmem_to_hbm [thread:$0]  (%p3766_p6), %s3627_s23, 256, %s3624_s13, %s1846_s0, %s2954_s21, %s2954_s21, %s2955_s5  }
 0xcb1 PF: > { %s3767_s8 = sld [smem:[#allocation31_spill]]  ;;  %p2367_p11 = scmp.ge.s32.totalorder %s2933_s7, 2 }
 0xcb2   : > { %s1874_s14 = sand.u32 1, %s2905_s24  }
 0xcb3   : > { %s1875_s26 = scalar_lea.sflag [#allocation5], %s1874_s14 }
 0xcb7   : > { %p3768_p2 = scmp.ne.s32.totalorder %s3767_s8, 0 }
 0xcb9   : > { %p2363_p4 = pnand %p2367_p11, %p3768_p2 }
 0xcbb   : > { %2888 = dma.done.wait (!%p2363_p4), %s1875_s26, 256  }
 0xcbc   : > { %2890 = vsyncadd (!%p2363_p4), %s1875_s26, 4294967040  ;;  %s31_s7 = sadd.s32 1, %s2933_s7   ;;  %s3769_s30 = sld [smem:[#allocation20_spill]] }
 0xcbd   : > { %p28_p3 = scmp.ge.s32.totalorder %s31_s7, 6   ;;  %s3770_s23 = sld [smem:[#allocation29_spill]] }
 0xcbe   : > { %s3771_s6 = sld [smem:[#allocation21_spill]]  ;;  %s3772_s26 = sld [smem:[#allocation30_spill]] }
 0xcbf   : > { %s3773_s28 = sld [smem:[#allocation24_spill]]  ;;  %s3774_s17 = sld [smem:[#allocation26_spill]] }
 0xcc0   : > { %s3775_s12 = sld [smem:[#allocation28_spill]]  ;;  %s3776_s21 = smov %s2897_s22 }
 0xcc1   : > { %s3778_s24 = smov %s2909_s25  ;;  %s3780_s27 = smov %s2925_s29 }
 0xcc2   : > { %s3777_s22 = smov %s3769_s30  ;;  %30 = sbr.rel (!%p28_p3) target bundleno = 21 (0x15), region = 158 }
 0xcc4   : > { %s3779_s25 = smov %s3771_s6 }
 0xcc5   : > { %s3781_s29 = smov %s3774_s17 }
 0xcc6   : > { %s3782_s30 = smov %s3775_s12 }
 0xcc9   :  { %1880 = vsyncpa [#allocation4], 1 }
 0xcca   :  { %1882 = vsyncpa [#allocation4 + $0x1], 1 }
 0xccb   :  { %1883 = vsyncpa [#allocation7], 1 }
 0xccc   :  { %1885 = vsyncpa [#allocation7 + $0x1], 1 }
 0xccd   :  { %1886 = vsyncpa [#allocation10], 1 }
 0xcce   :  { %1888 = vsyncpa [#allocation10 + $0x1], 1 }
 0xccf   :  { %1889 = vsyncpa [#allocation13], 1 }
 0xcd0   :  { %1891 = vsyncpa [#allocation13 + $0x1], 1 }
 0xcd1   :  { %1892 = vsyncpa [#allocation5], 1 }
 0xcd2   :  { %1894 = vsyncpa [#allocation5 + $0x1], 1 }

</bundles_post_ra>
